<compile_context>
chip_gen: v7x
topology: tpu7x:2x2x1
jax: 0.10.0
libtpu: 0.0.40
codegen_flags: <defaults>
</compile_context>

<pallas_src>
import functools
import math

import jax
import jax.numpy as jnp
from jax.experimental import pallas as pl
from jax.experimental.pallas import tpu as pltpu


# Safe on every generation (v5e/v6e: 128 MiB physical, v7x: 64 MiB); actual
# per-kernel scoped usage here is only a few MiB.
_VMEM_LIMIT = 32 * 1024 * 1024


def _pick_tile(dim, preferred, align):
    """Largest tile <= preferred that divides `dim` and is a multiple of
    `align`; falls back to the full dim (always a legal TPU block shape)."""
    if dim <= preferred:
        return dim
    t = (preferred // align) * align
    while t >= align:
        if dim % t == 0:
            return t
        t -= align
    return dim


# ------------------------- 1) fused QKV projection --------------------------

def _matmul_bias_kernel(x_ref, w_ref, b_ref, o_ref, acc_ref):
    @pl.when(pl.program_id(2) == 0)
    def _():
        acc_ref[...] = jnp.zeros_like(acc_ref)

    acc_ref[...] += jnp.dot(x_ref[...], w_ref[...],
                            preferred_element_type=jnp.float32)

    @pl.when(pl.program_id(2) == pl.num_programs(2) - 1)
    def _():
        o_ref[...] = (acc_ref[...] + b_ref[...].astype(jnp.float32)
                      ).astype(o_ref.dtype)


def matmul_bias(x, w, b, *, tm=256, tn=512, tk=512):
    """Tiled (M, K) @ (K, N) + b with an f32 VMEM accumulator."""
    M, K = x.shape
    _, N = w.shape
    tm = _pick_tile(M, tm, 8)
    tn = _pick_tile(N, tn, 128)
    tk = _pick_tile(K, tk, 128)
    return pl.pallas_call(
        _matmul_bias_kernel,
        out_shape=jax.ShapeDtypeStruct((M, N), x.dtype),
        grid_spec=pltpu.PrefetchScalarGridSpec(
            num_scalar_prefetch=0,
            grid=(M // tm, N // tn, K // tk),
            in_specs=[
                pl.BlockSpec((tm, tk), lambda i, j, k: (i, k)),
                pl.BlockSpec((tk, tn), lambda i, j, k: (k, j)),
                pl.BlockSpec((1, tn), lambda i, j, k: (0, j)),
            ],
            out_specs=pl.BlockSpec((tm, tn), lambda i, j, k: (i, j)),
            scratch_shapes=[pltpu.VMEM((tm, tn), jnp.float32)],
        ),
        compiler_params=pltpu.CompilerParams(
            dimension_semantics=("parallel", "parallel", "arbitrary"),
            vmem_limit_bytes=_VMEM_LIMIT),
    )(x, w, b.reshape(1, N))


# ------------------------------ 2) attention --------------------------------

def _attn_kernel(q_ref, k_ref, v_ref, o_ref, *, scale):
    q = q_ref[0].astype(jnp.float32) * scale          # fold 1/sqrt(Dh) into q
    k = k_ref[0].astype(jnp.float32)
    v = v_ref[0]
    # Contract the last dims directly — no k.T / XLU transpose.
    s = jax.lax.dot_general(q, k, (((1,), (1,)), ((), ())),
                            preferred_element_type=jnp.float32)
    s = s - jnp.max(s, axis=-1, keepdims=True)
    p = jnp.exp(s)
    p = p * pl.reciprocal(jnp.sum(p, axis=-1, keepdims=True), approx=True)
    o = jnp.dot(p.astype(v.dtype), v, preferred_element_type=jnp.float32)
    o_ref[0] = o.astype(o_ref.dtype)


def attention(qkv, nums_head, head_dim, scale):
    """qkv: (B, S, 3*D) packed projections -> (B, S, D) attention output.

    The per-head split/merge lives entirely in the BlockSpec index_maps (a
    Dh-wide column slab per head), so no transpose/reshape ever touches HBM.
    """
    B, S, D3 = qkv.shape
    D = D3 // 3
    H, Dh = nums_head, head_dim

    def slab(off):
        return pl.BlockSpec((1, S, Dh), lambda b, h, off=off: (b, 0, h + off))

    kernel = functools.partial(_attn_kernel, scale=scale)
    return pl.pallas_call(
        kernel,
        out_shape=jax.ShapeDtypeStruct((B, S, D), qkv.dtype),
        grid_spec=pltpu.PrefetchScalarGridSpec(
            num_scalar_prefetch=0,
            grid=(B, H),
            in_specs=[slab(0), slab(H), slab(2 * H)],     # q, k, v slabs
            out_specs=pl.BlockSpec((1, S, Dh), lambda b, h: (b, 0, h)),
        ),
        compiler_params=pltpu.CompilerParams(
            dimension_semantics=("parallel", "parallel"),
            vmem_limit_bytes=_VMEM_LIMIT),
    )(qkv, qkv, qkv)


# --------------- 3) output projection + residual + LayerNorm ----------------

def _out_proj_add_ln_kernel(attn_ref, wo_ref, bo_ref, x_ref, g_ref, b_ref,
                            attn_out_ref, h1_ref, acc_ref, *, eps):
    k = pl.program_id(1)

    @pl.when(k == 0)
    def _():
        acc_ref[...] = jnp.zeros_like(acc_ref)

    acc_ref[...] += jnp.dot(attn_ref[...], wo_ref[...],
                            preferred_element_type=jnp.float32)

    @pl.when(k == pl.num_programs(1) - 1)
    def _():
        attn_out = acc_ref[...] + bo_ref[...].astype(jnp.float32)
        attn_out_ref[...] = attn_out.astype(attn_out_ref.dtype)
        z = x_ref[...].astype(jnp.float32) + attn_out
        mean = jnp.mean(z, axis=-1, keepdims=True)
        var = jnp.mean(jnp.square(z - mean), axis=-1, keepdims=True)
        zn = (z - mean) * jax.lax.rsqrt(var + eps)
        h1_ref[...] = (zn * g_ref[...] + b_ref[...]).astype(h1_ref.dtype)


def out_proj_add_ln(attn, wo, bo, x, gamma, beta, *, eps=1e-5, tm=256, tk=512):
    """Returns (attn_out, LayerNorm(x + attn_out)); LN is fused as the matmul
    epilogue on the final K step."""
    M, K = attn.shape
    D = wo.shape[1]
    tm = _pick_tile(M, tm, 8)
    tk = _pick_tile(K, tk, 128)
    kernel = functools.partial(_out_proj_add_ln_kernel, eps=eps)
    return pl.pallas_call(
        kernel,
        out_shape=(jax.ShapeDtypeStruct((M, D), x.dtype),
                   jax.ShapeDtypeStruct((M, D), x.dtype)),
        grid_spec=pltpu.PrefetchScalarGridSpec(
            num_scalar_prefetch=0,
            grid=(M // tm, K // tk),
            in_specs=[
                pl.BlockSpec((tm, tk), lambda i, k: (i, k)),   # attention out
                pl.BlockSpec((tk, D), lambda i, k: (k, 0)),    # wo
                pl.BlockSpec((1, D), lambda i, k: (0, 0)),     # bo
                pl.BlockSpec((tm, D), lambda i, k: (i, 0)),    # x (residual)
                pl.BlockSpec((1, D), lambda i, k: (0, 0)),     # ln gamma
                pl.BlockSpec((1, D), lambda i, k: (0, 0)),     # ln beta
            ],
            out_specs=[pl.BlockSpec((tm, D), lambda i, k: (i, 0)),
                       pl.BlockSpec((tm, D), lambda i, k: (i, 0))],
            scratch_shapes=[pltpu.VMEM((tm, D), jnp.float32)],
        ),
        compiler_params=pltpu.CompilerParams(
            dimension_semantics=("parallel", "arbitrary"),
            vmem_limit_bytes=_VMEM_LIMIT),
    )(attn, wo, bo.reshape(1, D), x, gamma.reshape(1, D), beta.reshape(1, D))


# -------------------- 4) fused FFN + residual + LayerNorm -------------------

def _ffn_add_ln_kernel(h1_ref, w1_ref, b1_ref, w2_ref, b2_ref, res_ref,
                       g_ref, b_ref, o_ref, acc_ref, *, eps):
    f = pl.program_id(1)

    @pl.when(f == 0)
    def _():
        acc_ref[...] = jnp.zeros_like(acc_ref)

    # (tm, tf) ReLU intermediate lives only in VMEM / vregs, never in HBM.
    h = jnp.dot(h1_ref[...], w1_ref[...], preferred_element_type=jnp.float32)
    h = jnp.maximum(h + b1_ref[...].astype(jnp.float32), 0.0)
    acc_ref[...] += jnp.dot(h.astype(w2_ref.dtype), w2_ref[...],
                            preferred_element_type=jnp.float32)

    @pl.when(f == pl.num_programs(1) - 1)
    def _():
        y = acc_ref[...] + b2_ref[...].astype(jnp.float32)
        z = y + res_ref[...].astype(jnp.float32)
        mean = jnp.mean(z, axis=-1, keepdims=True)
        var = jnp.mean(jnp.square(z - mean), axis=-1, keepdims=True)
        zn = (z - mean) * jax.lax.rsqrt(var + eps)
        o_ref[...] = (zn * g_ref[...] + b_ref[...]).astype(o_ref.dtype)


def ffn_add_ln(h1, w1, b1, w2, b2, res, gamma, beta, *, eps=1e-5,
               tm=256, tf=512):
    """LayerNorm(relu(h1 @ w1 + b1) @ w2 + b2 + res), reducing over d_ff
    chunks so the (M, d_ff) activation never hits HBM."""
    M, D = h1.shape
    Dff = w1.shape[1]
    tm = _pick_tile(M, tm, 8)
    tf = _pick_tile(Dff, tf, 128)
    kernel = functools.partial(_ffn_add_ln_kernel, eps=eps)
    return pl.pallas_call(
        kernel,
        out_shape=jax.ShapeDtypeStruct((M, D), h1.dtype),
        grid_spec=pltpu.PrefetchScalarGridSpec(
            num_scalar_prefetch=0,
            grid=(M // tm, Dff // tf),
            in_specs=[
                pl.BlockSpec((tm, D), lambda i, f: (i, 0)),    # h1
                pl.BlockSpec((D, tf), lambda i, f: (0, f)),    # w1 column chunk
                pl.BlockSpec((1, tf), lambda i, f: (0, f)),    # b1 chunk
                pl.BlockSpec((tf, D), lambda i, f: (f, 0)),    # w2 row chunk
                pl.BlockSpec((1, D), lambda i, f: (0, 0)),     # b2
                pl.BlockSpec((tm, D), lambda i, f: (i, 0)),    # residual (attn_out)
                pl.BlockSpec((1, D), lambda i, f: (0, 0)),     # ln gamma
                pl.BlockSpec((1, D), lambda i, f: (0, 0)),     # ln beta
            ],
            out_specs=pl.BlockSpec((tm, D), lambda i, f: (i, 0)),
            scratch_shapes=[pltpu.VMEM((tm, D), jnp.float32)],
        ),
        compiler_params=pltpu.CompilerParams(
            dimension_semantics=("parallel", "arbitrary"),
            vmem_limit_bytes=_VMEM_LIMIT),
    )(h1, w1, b1.reshape(1, Dff), w2, b2.reshape(1, D), res,
      gamma.reshape(1, D), beta.reshape(1, D))


# ------------------------------ Encoder glue --------------------------------

def encoder_forward(params, x, mask=None):
    """x: (B, S, D) float32 -> (B, S, D) float32."""
    del mask  # TODO(synk): mask path not implemented (reference passes mask=None)
    B, S, D = x.shape
    H = params["nums_head"]
    Dh = D // H
    x2 = x.reshape(B * S, D)

    # 1) fused QKV projection (single tiled matmul, N = 3*D)
    qkv = matmul_bias(x2, params["w_qkv"], params["b_qkv"])          # (M, 3D)

    # 2) attention; head split/merge folded into BlockSpec index_maps
    attn = attention(qkv.reshape(B, S, 3 * D), H, Dh,
                     scale=1.0 / math.sqrt(Dh))                       # (B, S, D)

    # 3) output projection with fused residual + LayerNorm epilogue
    attn_out, h1 = out_proj_add_ln(attn.reshape(B * S, D), params["wo"],
                                   params["bo"], x2,
                                   params["ln_g"], params["ln_b"])

    # 4) fused FFN (w1 -> ReLU -> w2) + residual + LayerNorm.
    #    NOTE: the second residual reuses attn_out, exactly as in the PyTorch ref.
    out = ffn_add_ln(h1, params["w1"], params["b1"], params["w2"], params["b2"],
                     attn_out, params["ln_g"], params["ln_b"])
    return out.reshape(B, S, D)


# Pure-JAX reference (same math, no Pallas) for correctness check.
def encoder_reference(params, x):
    B, S, D = x.shape
    H = params["nums_head"]
    Dh = D // H
    x2 = x.reshape(B * S, D)

    def lin(t, w, b):
        return t @ w + b

    q = lin(x2, params["wq"], params["bq"]).reshape(B, S, H, Dh).transpose(0, 2, 1, 3)
    k = lin(x2, params["wk"], params["bk"]).reshape(B, S, H, Dh).transpose(0, 2, 1, 3)
    v = lin(x2, params["wv"], params["bv"]).reshape(B, S, H, Dh).transpose(0, 2, 1, 3)
    s = jnp.einsum("bhqd,bhkd->bhqk", q, k) / (Dh ** 0.5)
    p = jax.nn.softmax(s, axis=-1)
    o = jnp.einsum("bhqk,bhkd->bhqd", p, v).transpose(0, 2, 1, 3).reshape(B * S, D)
    attn_out = lin(o, params["wo"], params["bo"])

    def ln(z):
        mu = jnp.mean(z, -1, keepdims=True)
        var = jnp.mean((z - mu) ** 2, -1, keepdims=True)
        return (z - mu) * jax.lax.rsqrt(var + 1e-5) * params["ln_g"] + params["ln_b"]

    h1 = ln(x2 + attn_out)
    f = lin(jnp.maximum(lin(h1, params["w1"], params["b1"]), 0.0),
            params["w2"], params["b2"])
    return ln(f + attn_out).reshape(B, S, D)


# ---------------------------------- main ------------------------------------

if __name__ == "__main__":
    # Shapes from the module spec: d_model=512, d_ff=2048, batch=2, seq=10.
    # nums_head chosen so head_dim = 128 (one full vreg lane width).
    B, S, D, H, Dff = 2, 10, 512, 4, 2048
    key = jax.random.PRNGKey(0)
    ks = jax.random.split(key, 16)

    def w_init(k, shape):
        return jax.random.normal(k, shape, jnp.float32) * 0.02

    params = dict(
        nums_head=H,
        wq=w_init(ks[0], (D, D)), bq=w_init(ks[1], (D,)),
        wk=w_init(ks[2], (D, D)), bk=w_init(ks[3], (D,)),
        wv=w_init(ks[4], (D, D)), bv=w_init(ks[5], (D,)),
        wo=w_init(ks[6], (D, D)), bo=w_init(ks[7], (D,)),
        ln_g=1.0 + w_init(ks[8], (D,)), ln_b=w_init(ks[9], (D,)),
        w1=w_init(ks[10], (D, Dff)), b1=w_init(ks[11], (Dff,)),
        w2=w_init(ks[12], (Dff, D)), b2=w_init(ks[13], (D,)),
    )
    # One-time packing of the QKV weights (feeds the fused QKV matmul).
    params["w_qkv"] = jnp.concatenate(
        [params["wq"], params["wk"], params["wv"]], axis=1)
    params["b_qkv"] = jnp.concatenate(
        [params["bq"], params["bk"], params["bv"]])

    x = jax.random.normal(ks[14], (B, S, D), jnp.float32)

    out = encoder_forward(params, x)
    jax.block_until_ready(out)

    ref = encoder_reference(params, x)
    assert out.shape == (B, S, D)
    max_err = float(jnp.max(jnp.abs(out - ref)))
    assert jnp.allclose(out, ref, atol=2e-3, rtol=2e-3), (
        f"mismatch vs reference: max abs err {max_err:.3e}")

    print("KERNEL_OK")
</pallas_src>

<mosaic_0001>
module attributes {stable_mosaic.version = 11 : i64} {
  func.func @_matmul_bias_kernel(%arg0: i32, %arg1: i32, %arg2: i32, %arg3: memref<20x512xf32, #tpu.memory_space<vmem>>, %arg4: memref<512x512xf32, #tpu.memory_space<vmem>>, %arg5: memref<1x512xf32, #tpu.memory_space<vmem>>, %arg6: memref<20x512xf32, #tpu.memory_space<vmem>>, %arg7: memref<20x512xf32, #tpu.memory_space<vmem>>) attributes {dimension_semantics = [#tpu.dimension_semantics<parallel>, #tpu.dimension_semantics<parallel>, #tpu.dimension_semantics<arbitrary>], iteration_bounds = array<i64: 1, 3, 1>, scalar_prefetch = 0 : i64, scratch_operands = 1 : i64, tpu.core_type = #tpu.core_type<tc>, window_params = [{transform_indices = @transform_0, window_bounds = array<i64: 20, 512>}, {transform_indices = @transform_1, window_bounds = array<i64: 512, 512>}, {transform_indices = @transform_2, window_bounds = array<i64: 1, 512>}, {transform_indices = @transform_3, window_bounds = array<i64: 20, 512>}]} {
    %c0_i32 = arith.constant 0 : i32
    %0 = arith.cmpi eq, %arg2, %c0_i32 : i32
    %1 = arith.extui %0 : i1 to i32
    %c0_i32_0 = arith.constant 0 : i32
    %2 = arith.cmpi ne, %1, %c0_i32_0 : i32
    scf.if %2 {
      %cst_10 = arith.constant 0.000000e+00 : f32
      %12 = vector.broadcast %cst_10 : f32 to vector<20x512xf32>
      %c0_11 = arith.constant 0 : index
      %c0_12 = arith.constant 0 : index
      %13 = vector.load %arg7[%c0_11, %c0_12] : memref<20x512xf32, #tpu.memory_space<vmem>>, vector<20x512xf32>
      tpu.vector_store %arg7[%c0_11, %c0_12], %12 {strides = array<i32>} : memref<20x512xf32, #tpu.memory_space<vmem>>, vector<20x512xf32>,
    } else {
    }
    %c0 = arith.constant 0 : index
    %c0_1 = arith.constant 0 : index
    %3 = vector.load %arg7[%c0, %c0_1] : memref<20x512xf32, #tpu.memory_space<vmem>>, vector<20x512xf32>
    %c0_2 = arith.constant 0 : index
    %c0_3 = arith.constant 0 : index
    %4 = vector.load %arg3[%c0_2, %c0_3] : memref<20x512xf32, #tpu.memory_space<vmem>>, vector<20x512xf32>
    %c0_4 = arith.constant 0 : index
    %c0_5 = arith.constant 0 : index
    %5 = vector.load %arg4[%c0_4, %c0_5] : memref<512x512xf32, #tpu.memory_space<vmem>>, vector<512x512xf32>
    %cst = arith.constant dense<0.000000e+00> : vector<20x512xf32>
    %6 = tpu.matmul %4, %5, %cst {dimension_numbers = #tpu.dot_dimension_numbers<[1], [0], [0], [1], [0, 0, 1, 1], [], []>} : vector<20x512xf32>, vector<512x512xf32>, vector<20x512xf32> -> vector<20x512xf32>
    %7 = arith.addf %3, %6 : vector<20x512xf32>
    %c0_6 = arith.constant 0 : index
    %c0_7 = arith.constant 0 : index
    %8 = vector.load %arg7[%c0_6, %c0_7] : memref<20x512xf32, #tpu.memory_space<vmem>>, vector<20x512xf32>
    tpu.vector_store %arg7[%c0_6, %c0_7], %7 {strides = array<i32>} : memref<20x512xf32, #tpu.memory_space<vmem>>, vector<20x512xf32>,
    %c0_i32_8 = arith.constant 0 : i32
    %9 = arith.cmpi eq, %arg2, %c0_i32_8 : i32
    %10 = arith.extui %9 : i1 to i32
    %c0_i32_9 = arith.constant 0 : i32
    %11 = arith.cmpi ne, %10, %c0_i32_9 : i32
    scf.if %11 {
      %c0_10 = arith.constant 0 : index
      %c0_11 = arith.constant 0 : index
      %12 = vector.load %arg7[%c0_10, %c0_11] : memref<20x512xf32, #tpu.memory_space<vmem>>, vector<20x512xf32>
      %c0_12 = arith.constant 0 : index
      %c0_13 = arith.constant 0 : index
      %13 = vector.load %arg5[%c0_12, %c0_13] : memref<1x512xf32, #tpu.memory_space<vmem>>, vector<1x512xf32>
      %14 = vector.broadcast %13 : vector<1x512xf32> to vector<20x512xf32>
      %15 = arith.addf %12, %14 : vector<20x512xf32>
      %c0_14 = arith.constant 0 : index
      %c0_15 = arith.constant 0 : index
      %16 = vector.load %arg6[%c0_14, %c0_15] : memref<20x512xf32, #tpu.memory_space<vmem>>, vector<20x512xf32>
      tpu.vector_store %arg6[%c0_14, %c0_15], %15 {strides = array<i32>} : memref<20x512xf32, #tpu.memory_space<vmem>>, vector<20x512xf32>,
    } else {
    }
    return
  }
  func.func @transform_0(%arg0: i32, %arg1: i32, %arg2: i32) -> (i32, i32) {
    %c0_i32 = arith.constant 0 : i32
    return %arg0, %arg2 : i32, i32
  }
  func.func @transform_1(%arg0: i32, %arg1: i32, %arg2: i32) -> (i32, i32) {
    %c0_i32 = arith.constant 0 : i32
    return %arg2, %arg1 : i32, i32
  }
  func.func @transform_2(%arg0: i32, %arg1: i32, %arg2: i32) -> (i32, i32) {
    %c0_i32 = arith.constant 0 : i32
    %c0_i32_0 = arith.constant 0 : i32
    return %c0_i32, %arg1 : i32, i32
  }
  func.func @transform_3(%arg0: i32, %arg1: i32, %arg2: i32) -> (i32, i32) {
    %c0_i32 = arith.constant 0 : i32
    return %arg0, %arg1 : i32, i32
  }
}

</mosaic_0001>

<bundles_post_ra>
// kernel: tpu_custom_call.1
= control target key start
LH: loop header
LB: loop body
LE: loop exit
PB: predicated region body
PF: predicated region fallthrough
CT: control target
= control target key end

     0   :  { %s2260_s0 = inlined_call_operand.hbm [shape: f32[20,512], index: 0, kind: input, shape index: {}]   ;;  %s2261_s1 = inlined_call_operand.hbm [shape: f32[512,1536], index: 1, kind: input, shape index: {}]   ;;  %s2262_s2 = inlined_call_operand.hbm [shape: f32[1,1536], index: 2, kind: input, shape index: {}]   ;;  %s2263_s3 = inlined_call_operand.hbm [shape: f32[20,1536], index: 3, kind: output, shape index: {}]  }
   0x1   :  { %2271 = sst [smem:[#allocation13_spill]] %s2261_s1 }
   0x2   :  { %8 = vsyncpa [#allocation4], 0 }
   0x3   :  { %9 = vsyncpa [#allocation7], 0 }
   0x4   :  { %11 = vsyncpa [#allocation7 + $0x1], 0 }
   0x5   :  { %12 = vsyncpa [#allocation5], 0 }
   0x6   :  { %14 = vsyncpa [#allocation5 + $0x1], 0  ;;  %s1725_s12 = smov 0   ;;  %s1727_s13 = smov 0  }
   0x7   :  { %s1729_s14 = smov 0   ;;  %s1731_s15 = smov 0  }
   0x8   :  { %s1733_s16 = smov 0   ;;  %s1735_s17 = smov 0  }
   0x9 LB: > { %s35_s18 = sadd.s32 1, %s1688_s16  ;;  %s76_s19 = sadd.s32 1, %s1680_s14  ;;  %s1692_s17 = sphi %s1735_s17, %s20_s17   ;;  %s1688_s16 = sphi %s1733_s16, %s2293_s16   ;;  %s1684_s15 = sphi %s1731_s15, %s2292_s15   ;;  %s1680_s14 = sphi %s1729_s14, %s2291_s14   ;;  %s1676_s13 = sphi %s1727_s13, %s2290_s13   ;;  %s1672_s12 = sphi %s1725_s12, %s2289_s12  }
   0xa   : > { %p37_p0 = scmp.ge.s32.totalorder %s35_s18, 3  ;;  %p83_p1 = scmp.ne.s32.totalorder %s1680_s14, %s1676_s13 }
   0xb   : > { %p84_p2 = scmp.eq.s32.totalorder %s1692_s17, 0  ;;  %p1459_p5 = scmp.lt.s32.totalorder %s1692_s17, 3 }
   0xc   : > { %s2295_s18 = smov (%p37_p0, %s35_s18), 0  ;;  %s186_s22 = sand.u32 1, %s1692_s17  }
   0xd   : > { %p1765_p3 = por %p84_p2, %p83_p1  ;;  %s72_s21 = ssub.s32 %s1688_s16, %s2295_s18 }
   0xe   : > { %p74_p4 = scmp.eq.s32.totalorder %s72_s21, 0  ;;  %s188_s23 = sand.u32 1, %s1680_s14  }
   0xf   : > { %s1147_s25 = sshll.u32 %s188_s23, 11  ;;  %s1161_s26 = sshll.u32 %s1688_s16, 9 }
  0x10   : > { %s1775_s24 = scalar_select %p74_p4, %s1680_s14, %s76_s19  }
  0x11   : > { %s2273_s1 = sld [smem:[#allocation13_spill]]  ;;  %s190_s30 = scalar_lea.vmem [#allocation6], %s1147_s25 }
  0x12   : > { %s200_s4 = sshll.u32 %s190_s30, 4  ;;  %p1789_p6 = pnand %p1459_p5, %p1765_p3  ;;  %s1785_s4 = int_to_ptr.vmem [resolvable:$true] %s200_s4 }
  0x13   : > { %s1793_s6 = scalar_lea.sflag [#allocation7], %s186_s22 }
  0x14   : > { %p1520_p8 = pneg %p1789_p6 }
  0x17   : > { %s1783_s29 = scalar_lea.hbm %s2273_s1, %s1161_s26  ;;  %s1523_s10 = scalar_lea.hbm %s2273_s1, 98304 }
  0x18   : > { %s1518_s7 = scalar_lea.hbm %s1783_s29, 32768  ;;  %p1524_p11 = scmp.lt.u32.totalorder %s1783_s29, %s2273_s1 }
  0x19   : > { %p1519_p7 = scmp.ne.s32.totalorder %s1783_s29, %s1518_s7  ;;  %p1525_p12 = scmp.lt.u32.totalorder %s1523_s10, %s1518_s7 }
  0x1a   : > { %p1527_p0 = scmp.lt.u32.totalorder %s1518_s7, %s1783_s29 }
  0x1b   : > { %p1521_p9 = pnand %p1520_p8, %p1519_p7  ;;  %p1526_p13 = por %p1525_p12, %p1524_p11 }
  0x1d   : > { %p1522_p10 = pneg %p1521_p9  ;;  %p1528_p2 = por %p1527_p0, %p1526_p13 }
  0x1f   : > { %p1529_p3 = pnand %p1528_p2, %p1522_p10 }
  0x21   : > { %1532 = shalt.err (!%p1529_p3)
}
  0x22   : > { %s1533_s20 = scalar_lea.vmem %s1785_s4, 32768  ;;  %s1694_s21 = smov [#allocation6]  }
  0x23   : > { %p1534_p4 = scmp.ne.s32.totalorder %s1785_s4, %s1533_s20  ;;  %s1538_s22 = sshll.u32 %s1694_s21, 4  ;;  %s1539_s22 = int_to_ptr.vmem [resolvable:$false] %s1538_s22 }
  0x24   : > { %s1540_s25 = scalar_lea.vmem %s1539_s22, 65536  ;;  %p1541_p9 = scmp.lt.s32.totalorder %s1785_s4, %s1539_s22 }
  0x25   : > { %p1536_p5 = pnand %p1534_p4, %p1520_p8  ;;  %p1542_p11 = scmp.lt.s32.totalorder %s1540_s25, %s1533_s20 }
  0x27   : > { %p1537_p7 = pneg %p1536_p5  ;;  %p1543_p12 = por %p1542_p11, %p1541_p9 }
  0x29   : > { %p1544_p13 = pnand %p1543_p12, %p1537_p7 }
  0x2b   : > { %1547 = shalt.err (!%p1544_p13)
}
  0x2c   : > { %s1695_s26 = smov 1536   ;;  %s2264_s27 = smov 512  }
  0x2d   : > { %s2265_s28 = smov 32   ;;  %s1824_s30 = sadd.s32 4294967295, %s1692_s17  }
  0x2e   : > { %1450 = dma.hbm_to_vmem [thread:$0]  (!%p1789_p6), %s1783_s29, 32768, %s1785_s4, %s1793_s6, %s1695_s26, %s2264_s27, %s2265_s28  }
  0x2f   : > { %s1143_s7 = sadd.s32 4294967294, %s1692_s17   ;;  %p89_p10 = scmp.ne.s32.totalorder %s1676_s13, %s1672_s12 }
  0x30   : > { %p2266_p0 = scmp.eq.s32.totalorder %s1824_s30, 0  ;;  %p141_p2 = scmp.eq.s32.totalorder %s1824_s30, 2 }
  0x31   : > { %p147_p3 = scmp.eq.s32.totalorder %s1143_s7, 2  ;;  %p1144_p5 = scmp.ge.s32.totalorder %s1692_s17, 1 }
  0x32   : > { %p1833_p4 = por %p2266_p0, %p89_p10  ;;  %p1841_p7 = por %p141_p2, %p83_p1 }
  0x33   : > { %p1845_p9 = por %p147_p3, %p89_p10  ;;  %p154_p11 = scmp.lt.s32.totalorder %s1692_s17, 4 }
  0x34   : > { %s2275_s8 = scalar_select %p1833_p4, 1, 0 }
  0x35   : > { %s2276_s29 = scalar_select %p1841_p7, 1, 0 }
  0x36   : > { %s2277_s4 = scalar_select %p1845_p9, 1, 0 }
  0x37   : > { %s1150_s9 = sshll.u32 %s188_s23, 2  ;;  %p1852_p12 = pnand %p1144_p5, %p154_p11 }
  0x38   : > { %s1698_s11 = smov [#allocation3]   ;;  %s1162_s20 = sshll.u32 %s1688_s16, 6 }
  0x39   : > { %s2278_s10 = scalar_select %p1852_p12, 1, 0 }
  0x3a   : > { %s172_s19 = sshll.u32 %s1698_s11, 4  ;;  %p1443_p1 = pneg %p1852_p12  ;;  %s1856_s19 = int_to_ptr.vmem [resolvable:$true] %s172_s19 }
  0x3b   : > { %s1864_s25 = scalar_lea.hbm %s2262_s2, %s1162_s20  ;;  %s214_s23 = scalar_lea.vmem [#allocation8], %s1150_s9 }
  0x3c   : > { %s222_s26 = sshll.u32 %s214_s23, 4  ;;  %p1868_p13 = pnand %p1443_p1, %p2266_p0  ;;  %s223_s26 = int_to_ptr.vmem [resolvable:$true] %s222_s26 }
  0x3d   : > { %s1548_s11 = scalar_lea.hbm %s1864_s25, 64  ;;  %s1553_s22 = scalar_lea.hbm %s2262_s2, 192 }
  0x3e   : > { %s2279_s7 = scalar_select %p1868_p13, 1, 0 }
  0x3f   : > { %p1549_p10 = scmp.ne.s32.totalorder %s1864_s25, %s1548_s11  ;;  %p1554_p5 = scmp.lt.u32.totalorder %s1864_s25, %s2262_s2 }
  0x40   : > { %p1555_p11 = scmp.lt.u32.totalorder %s1553_s22, %s1548_s11  ;;  %p1557_p0 = scmp.lt.u32.totalorder %s1548_s11, %s1864_s25 }
  0x41   : > { %p1551_p2 = pnand %p1549_p10, %p1520_p8 }
  0x42   : > { %p1556_p1 = por %p1555_p11, %p1554_p5 }
  0x43   : > { %p1552_p3 = pneg %p1551_p2 }
  0x44   : > { %p1558_p9 = por %p1557_p0, %p1556_p1 }
  0x46   : > { %p1559_p7 = pnand %p1558_p9, %p1552_p3 }
  0x48   : > { %1562 = shalt.err (!%p1559_p7)
}
  0x49   : > { %s1563_s9 = scalar_lea.vmem %s223_s26, 64  ;;  %s1699_s23 = smov [#allocation8]  }
  0x4a   : > { %p1564_p4 = scmp.ne.s32.totalorder %s223_s26, %s1563_s9  ;;  %s1568_s20 = sshll.u32 %s1699_s23, 4  ;;  %s1569_s20 = int_to_ptr.vmem [resolvable:$false] %s1568_s20 }
  0x4b   : > { %s1570_s21 = scalar_lea.vmem %s1569_s20, 128  ;;  %p1571_p12 = scmp.lt.s32.totalorder %s223_s26, %s1569_s20 }
  0x4c   : > { %p1566_p10 = pnand %p1564_p4, %p1520_p8  ;;  %p1572_p13 = scmp.lt.s32.totalorder %s1570_s21, %s1563_s9 }
  0x4e   : > { %p1567_p2 = pneg %p1566_p10  ;;  %p1573_p5 = por %p1572_p13, %p1571_p12 }
  0x50   : > { %p1574_p11 = pnand %p1573_p5, %p1567_p2 }
  0x52   : > { %1577 = shalt.err (!%p1574_p11)
}
  0x53   : > { %1453 = dma.hbm_to_vmem [thread:$0]  (!%p1789_p6), %s1864_s25, 64, %s223_s26, %s1793_s6  }
  0x54   : > { %s1578_s11 = scalar_lea.hbm %s2260_s0, 1536  ;;  %p2280_p0 = scmp.ne.s32.totalorder %s2279_s7, 0 }
  0x55   : > { %p1579_p8 = scmp.ne.s32.totalorder %s2260_s0, %s1578_s11  ;;  %p1585_p12 = scmp.lt.u32.totalorder %s1578_s11, %s2260_s0 }
  0x56   : > { %p1580_p4 = pneg %p2280_p0 }
  0x58   : > { %p1581_p7 = pnand %p1580_p4, %p1579_p8 }
  0x5a   : > { %p1582_p9 = pneg %p1581_p7 }
  0x5c   : > { %p1587_p13 = pnand %p1585_p12, %p1582_p9 }
  0x5e   : > { %1590 = shalt.err (!%p1587_p13)
}
  0x5f   : > { %s1591_s5 = scalar_lea.vmem %s1856_s19, 1536  ;;  %p1599_p10 = scmp.lt.s32.totalorder %s1856_s19, %s1856_s19 }
  0x60   : > { %p1592_p6 = scmp.ne.s32.totalorder %s1856_s19, %s1591_s5  ;;  %p1600_p2 = scmp.lt.s32.totalorder %s1591_s5, %s1591_s5 }
  0x62   : > { %p1594_p3 = pnand %p1592_p6, %p1580_p4  ;;  %p1601_p5 = por %p1600_p2, %p1599_p10 }
  0x64   : > { %p1595_p1 = pneg %p1594_p3 }
  0x66   : > { %p1602_p11 = pnand %p1601_p5, %p1595_p1 }
  0x68   : > { %1605 = shalt.err (!%p1602_p11)
}
  0x69   : > { %s2281_s1 = smov 32   ;;  %s2282_s6 = smov 512  }
  0x6a   : > { %1446 = dma.hbm_to_vmem [thread:$0]  (!%p2280_p0), %s2260_s0, 1536, %s1856_s19, [#allocation4], %s2282_s6, %s2282_s6, %s2281_s1  }
  0x6b   : > { %p2283_p8 = scmp.ne.s32.totalorder %s2278_s10, 0 }
  0x6c   : > { %p2284_p4 = scmp.eq.s32.totalorder (!%p2283_p8), %s1824_s30, 0 }
  0x6d   : > { %231 = sbr.rel (%p2283_p8) target bundleno = 504 (0x1f8), region = 32 }
  0x74   : > { %1659 = dma.done.wait (%p2284_p4), [#allocation4], 1536   ;;  %p2285_p7 = pmov %p2284_p4 }
  0x75   : > { %s237_s7 = sand.u32 1, %s1824_s30   ;;  %s1924_s20 = sand.u32 1, %s1676_s13  }
  0x76   : > { %1661 = vsyncadd (%p2285_p7), [#allocation4], 4294965760  ;;  %s1155_s21 = sshll.u32 %s1924_s20, 11  ;;  %s238_s27 = scalar_lea.sflag [#allocation7], %s237_s7 }
  0x77   : > { %s1927_s28 = scalar_lea.vmem [#allocation6], %s1155_s21  ;;  %p2286_p0 = scmp.ne.s32.totalorder %s2275_s8, 0 }
  0x79   : > { %1663 = dma.done.wait (%p2286_p0), %s238_s27, 32832  }
  0x7a   : > { %1665 = vsyncadd (%p2286_p0), %s238_s27, 4294934464  ;;  %v326_v0 = vld [vmem:[%s1927_s28 + $0x8] sm:$0xff]  ;;  %v328_v2 = vld [vmem:[%s1927_s28 + $0x18] sm:$0xff]  ;;  %v1700_v56 = vmov 0.0   ;;  %s1156_s30 = sshll.u32 %s1924_s20, 2  ;;  %s1432_s10 = smul.u32 96, %s1924_s20 }
  0x7b   : > { %v330_v1 = vld [vmem:[%s1927_s28 + $0x28] sm:$0xff]  ;;  %v332_v4 = vld [vmem:[%s1927_s28 + $0x38] sm:$0xff]  ;;  %v325_v5 = vld [vmem:[%s1927_s28] sm:$0xff]  ;;  %297 = vst [vmem:[#allocation2 + $0x40] sm:$0xf] %v1700_v56  ;;  %s250_s8 = scalar_lea.vmem [#allocation8], %s1156_s30 }
  0x7c   : > { %v1164_v3 = vpack.c.bf16 %v330_v1, %v326_v0  ;;  %v329_v6 = vld [vmem:[%s1927_s28 + $0x20] sm:$0xff]  ;;  %v1292_v7 = vpack.c.bf16 %v332_v4, %v328_v2  ;;  %v327_v9 = vld [vmem:[%s1927_s28 + $0x10] sm:$0xff]  ;;  %v334_v11 = vld [vmem:[%s1927_s28 + $0x48] sm:$0xff]  ;;  %298 = vst [vmem:[#allocation2 + $0x48] sm:$0xf] %v1700_v56  ;;  %s2191_s19 = scalar_lea.vmem [#allocation9], %s1432_s10 }
  0x7d   : > { %v1166_v8 = vpack.c.bf16 %v329_v6, %v325_v5  ;;  %v331_v10 = vld [vmem:[%s1927_s28 + $0x30] sm:$0xff]  ;;  %v338_v13 = vld [vmem:[%s1927_s28 + $0x68] sm:$0xff]  ;;  %v336_v14 = vld [vmem:[%s1927_s28 + $0x58] sm:$0xff]  ;;  %299 = vst [vmem:[#allocation2 + $0x50] sm:$0xf] %v1700_v56  ;;  %s1163_s11 = sshll.u32 %s1684_s15, 9 }
  0x7e   : > { %1165 = vmatprep.subr.bf16.mxu0 %v1164_v3  ;;  %v1294_v12 = vpack.c.bf16 %v331_v10, %v327_v9  ;;  %v340_v15 = vld [vmem:[%s1927_s28 + $0x78] sm:$0xff]  ;;  %1293 = vmatprep.subr.bf16.mxu1 %v1292_v7  ;;  %v1168_v16 = vpack.c.bf16 %v338_v13, %v334_v11  ;;  %v333_v18 = vld [vmem:[%s1927_s28 + $0x40] sm:$0xff]  ;;  %v335_v20 = vld [vmem:[%s1927_s28 + $0x50] sm:$0xff]  ;;  %300 = vst [vmem:[#allocation2 + $0x58] sm:$0xf] %v1700_v56  ;;  %s1015_s22 = sshll.u32 %s2191_s19, 4  ;;  %s2206_s5 = scalar_lea.hbm %s2263_s3, %s1163_s11  ;;  %s2208_s22 = int_to_ptr.vmem [resolvable:$true] %s1015_s22 }
  0x7f   : > { %1167 = vmatpush1.bf16.msra.mxu0 %v1166_v8  ;;  %v1296_v17 = vpack.c.bf16 %v340_v15, %v336_v14  ;;  %v337_v19 = vld [vmem:[%s1927_s28 + $0x60] sm:$0xff]  ;;  %v339_v22 = vld [vmem:[%s1927_s28 + $0x70] sm:$0xff]  ;;  %v342_v23 = vld [vmem:[%s1927_s28 + $0x88] sm:$0xff]  ;;  %s999_s15 = scalar_lea.sflag [#allocation5], %s1924_s20  ;;  %s1606_s1 = scalar_lea.vmem %s2208_s22, 1536 }
  0x80   : > { %1295 = vmatpush1.bf16.msra.mxu1 %v1294_v12  ;;  %v1170_v21 = vpack.c.bf16 %v337_v19, %v333_v18  ;;  %v346_v24 = vld [vmem:[%s1927_s28 + $0xa8] sm:$0xff]  ;;  %1169 = vmatprep.subr.bf16.mxu0 %v1168_v16  ;;  %v1298_v25 = vpack.c.bf16 %v339_v22, %v335_v20  ;;  %v344_v27 = vld [vmem:[%s1927_s28 + $0x98] sm:$0xff]  ;;  %v341_v29 = vld [vmem:[%s1927_s28 + $0x80] sm:$0xff]  ;;  %p1607_p9 = scmp.ne.s32.totalorder %s2208_s22, %s1606_s1  ;;  %p2287_p12 = scmp.ne.s32.totalorder %s2276_s29, 0 }
  0x81   : > { %1297 = vmatprep.subr.bf16.mxu1 %v1296_v17  ;;  %v1172_v26 = vpack.c.bf16 %v346_v24, %v342_v23  ;;  %v348_v28 = vld [vmem:[%s1927_s28 + $0xb8] sm:$0xff]  ;;  %v345_v31 = vld [vmem:[%s1927_s28 + $0xa0] sm:$0xff]  ;;  %v343_v32 = vld [vmem:[%s1927_s28 + $0x90] sm:$0xff]  ;;  %s1701_s6 = smov [#allocation9]  }
  0x82   : > { %v1300_v30 = vpack.c.bf16 %v348_v28, %v344_v27  ;;  %v347_v33 = vld [vmem:[%s1927_s28 + $0xb0] sm:$0xff]  ;;  %v1174_v34 = vpack.c.bf16 %v345_v31, %v341_v29  ;;  %v350_v35 = vld [vmem:[%s1927_s28 + $0xc8] sm:$0xff]  ;;  %v352_v37 = vld [vmem:[%s1927_s28 + $0xd8] sm:$0xff]  ;;  %p1608_p13 = pnand %p1607_p9, %p2287_p12  ;;  %s1610_s25 = sshll.u32 %s1701_s6, 4  ;;  %s1611_s25 = int_to_ptr.vmem [resolvable:$false] %s1610_s25 }
  0x83   : > { %1171 = vmatpush1.bf16.msra.mxu0 %v1170_v21  ;;  %v354_v36 = vld [vmem:[%s1927_s28 + $0xe8] sm:$0xff]  ;;  %v1302_v38 = vpack.c.bf16 %v347_v33, %v343_v32  ;;  %v356_v40 = vld [vmem:[%s1927_s28 + $0xf8] sm:$0xff]  ;;  %v349_v41 = vld [vmem:[%s1927_s28 + $0xc0] sm:$0xff]  ;;  %s1612_s26 = scalar_lea.vmem %s1611_s25, 3072  ;;  %p1613_p3 = scmp.lt.s32.totalorder %s2208_s22, %s1611_s25 }
  0x84   : > { %1299 = vmatpush1.bf16.msra.mxu1 %v1298_v25  ;;  %1173 = vmatprep.subr.bf16.mxu0 %v1172_v26  ;;  %v1176_v39 = vpack.c.bf16 %v354_v36, %v350_v35  ;;  %v353_v42 = vld [vmem:[%s1927_s28 + $0xe0] sm:$0xff]  ;;  %v1304_v43 = vpack.c.bf16 %v356_v40, %v352_v37  ;;  %v351_v44 = vld [vmem:[%s1927_s28 + $0xd0] sm:$0xff]  ;;  %v358_v46 = vld [vmem:[%s1927_s28 + $0x108] sm:$0xff]  ;;  %p1609_p6 = pneg %p1608_p13  ;;  %p1614_p1 = scmp.lt.s32.totalorder %s1612_s26, %s1606_s1 }
  0x85   : > { %1301 = vmatprep.subr.bf16.mxu1 %v1300_v30  ;;  %v355_v45 = vld [vmem:[%s1927_s28 + $0xf0] sm:$0xff]  ;;  %v362_v47 = vld [vmem:[%s1927_s28 + $0x128] sm:$0xff]  ;;  %v360_v48 = vld [vmem:[%s1927_s28 + $0x118] sm:$0xff]  ;;  %v1178_v50 = vpack.c.bf16 %v353_v42, %v349_v41 }
  0x86   : > { %v364_v49 = vld [vmem:[%s1927_s28 + $0x138] sm:$0xff]  ;;  %v1306_v51 = vpack.c.bf16 %v355_v45, %v351_v44  ;;  %v1180_v52 = vpack.c.bf16 %v362_v47, %v358_v46  ;;  %v357_v53 = vld [vmem:[%s1927_s28 + $0x100] sm:$0xff]  ;;  %v359_v55 = vld [vmem:[%s1927_s28 + $0x110] sm:$0xff]  ;;  %p1615_p10 = por %p1614_p1, %p1613_p3 }
  0x87   : > { %1175 = vmatpush1.bf16.msra.mxu0 %v1174_v34  ;;  %v361_v54 = vld [vmem:[%s1927_s28 + $0x120] sm:$0xff]  ;;  %v1308_v57 = vpack.c.bf16 %v364_v49, %v360_v48  ;;  %v363_v58 = vld [vmem:[%s1927_s28 + $0x130] sm:$0xff]  ;;  %v366_v59 = vld [vmem:[%s1927_s28 + $0x148] sm:$0xff] }
  0x88   : > { %1303 = vmatpush1.bf16.msra.mxu1 %v1302_v38  ;;  %1177 = vmatprep.subr.bf16.mxu0 %v1176_v39  ;;  %v370_v60 = vld [vmem:[%s1927_s28 + $0x168] sm:$0xff]  ;;  %v368_v61 = vld [vmem:[%s1927_s28 + $0x158] sm:$0xff]  ;;  %v1182_v63 = vpack.c.bf16 %v361_v54, %v357_v53  ;;  %v1310_v0 = vpack.c.bf16 %v363_v58, %v359_v55  ;;  %v365_v2 = vld [vmem:[%s1927_s28 + $0x140] sm:$0xff]  ;;  %p1616_p2 = pnand %p1615_p10, %p1609_p6 }
  0x89   : > { %1305 = vmatprep.subr.bf16.mxu1 %v1304_v43  ;;  %v372_v62 = vld [vmem:[%s1927_s28 + $0x178] sm:$0xff]  ;;  %v1184_v1 = vpack.c.bf16 %v370_v60, %v366_v59  ;;  %v369_v3 = vld [vmem:[%s1927_s28 + $0x160] sm:$0xff]  ;;  %v367_v4 = vld [vmem:[%s1927_s28 + $0x150] sm:$0xff] }
  0x8a   : > { %v1312_v5 = vpack.c.bf16 %v372_v62, %v368_v61  ;;  %v371_v6 = vld [vmem:[%s1927_s28 + $0x170] sm:$0xff]  ;;  %v374_v7 = vld [vmem:[%s1927_s28 + $0x188] sm:$0xff]  ;;  %v376_v9 = vld [vmem:[%s1927_s28 + $0x198] sm:$0xff]  ;;  %v1186_v11 = vpack.c.bf16 %v369_v3, %v365_v2 }
  0x8b   : > { %1179 = vmatpush1.bf16.msra.mxu0 %v1178_v50  ;;  %v378_v8 = vld [vmem:[%s1927_s28 + $0x1a8] sm:$0xff]  ;;  %v380_v10 = vld [vmem:[%s1927_s28 + $0x1b8] sm:$0xff]  ;;  %v1314_v12 = vpack.c.bf16 %v371_v6, %v367_v4  ;;  %v373_v14 = vld [vmem:[%s1927_s28 + $0x180] sm:$0xff] }
  0x8c   : > { %1307 = vmatpush1.bf16.msra.mxu1 %v1306_v51  ;;  %1181 = vmatprep.subr.bf16.mxu0 %v1180_v52  ;;  %v1188_v13 = vpack.c.bf16 %v378_v8, %v374_v7  ;;  %v377_v15 = vld [vmem:[%s1927_s28 + $0x1a0] sm:$0xff]  ;;  %v375_v16 = vld [vmem:[%s1927_s28 + $0x190] sm:$0xff]  ;;  %v1316_v17 = vpack.c.bf16 %v380_v10, %v376_v9  ;;  %v382_v19 = vld [vmem:[%s1927_s28 + $0x1c8] sm:$0xff] }
  0x8d   : > { %1309 = vmatprep.subr.bf16.mxu1 %v1308_v57  ;;  %v379_v18 = vld [vmem:[%s1927_s28 + $0x1b0] sm:$0xff]  ;;  %v386_v20 = vld [vmem:[%s1927_s28 + $0x1e8] sm:$0xff]  ;;  %v384_v21 = vld [vmem:[%s1927_s28 + $0x1d8] sm:$0xff]  ;;  %v1190_v23 = vpack.c.bf16 %v377_v15, %v373_v14 }
  0x8e   : > { %v388_v22 = vld [vmem:[%s1927_s28 + $0x1f8] sm:$0xff]  ;;  %v1318_v24 = vpack.c.bf16 %v379_v18, %v375_v16  ;;  %v1192_v25 = vpack.c.bf16 %v386_v20, %v382_v19  ;;  %v381_v26 = vld [vmem:[%s1927_s28 + $0x1c0] sm:$0xff]  ;;  %v383_v28 = vld [vmem:[%s1927_s28 + $0x1d0] sm:$0xff] }
  0x8f   : > { %1183 = vmatpush1.bf16.msra.mxu0 %v1182_v63  ;;  %v385_v27 = vld [vmem:[%s1927_s28 + $0x1e0] sm:$0xff]  ;;  %v1320_v29 = vpack.c.bf16 %v388_v22, %v384_v21  ;;  %v387_v30 = vld [vmem:[%s1927_s28 + $0x1f0] sm:$0xff]  ;;  %v390_v31 = vld [vmem:[%s1927_s28 + $0x208] sm:$0xff] }
  0x90   : > { %1311 = vmatpush1.bf16.msra.mxu1 %v1310_v0  ;;  %1185 = vmatprep.subr.bf16.mxu0 %v1184_v1  ;;  %v394_v32 = vld [vmem:[%s1927_s28 + $0x228] sm:$0xff]  ;;  %v392_v33 = vld [vmem:[%s1927_s28 + $0x218] sm:$0xff]  ;;  %v1194_v35 = vpack.c.bf16 %v385_v27, %v381_v26  ;;  %v1322_v36 = vpack.c.bf16 %v387_v30, %v383_v28  ;;  %v389_v38 = vld [vmem:[%s1927_s28 + $0x200] sm:$0xff] }
  0x91   : > { %1313 = vmatprep.subr.bf16.mxu1 %v1312_v5  ;;  %v396_v34 = vld [vmem:[%s1927_s28 + $0x238] sm:$0xff]  ;;  %v1196_v37 = vpack.c.bf16 %v394_v32, %v390_v31  ;;  %v393_v39 = vld [vmem:[%s1927_s28 + $0x220] sm:$0xff]  ;;  %v391_v40 = vld [vmem:[%s1927_s28 + $0x210] sm:$0xff] }
  0x92   : > { %v1324_v41 = vpack.c.bf16 %v396_v34, %v392_v33  ;;  %v395_v42 = vld [vmem:[%s1927_s28 + $0x230] sm:$0xff]  ;;  %v398_v43 = vld [vmem:[%s1927_s28 + $0x248] sm:$0xff]  ;;  %v400_v45 = vld [vmem:[%s1927_s28 + $0x258] sm:$0xff]  ;;  %v1198_v47 = vpack.c.bf16 %v393_v39, %v389_v38 }
  0x93   : > { %1187 = vmatpush1.bf16.msra.mxu0 %v1186_v11  ;;  %v402_v44 = vld [vmem:[%s1927_s28 + $0x268] sm:$0xff]  ;;  %v404_v46 = vld [vmem:[%s1927_s28 + $0x278] sm:$0xff]  ;;  %v1326_v48 = vpack.c.bf16 %v395_v42, %v391_v40  ;;  %v397_v50 = vld [vmem:[%s1927_s28 + $0x240] sm:$0xff] }
  0x94   : > { %1315 = vmatpush1.bf16.msra.mxu1 %v1314_v12  ;;  %1189 = vmatprep.subr.bf16.mxu0 %v1188_v13  ;;  %v1200_v49 = vpack.c.bf16 %v402_v44, %v398_v43  ;;  %v401_v51 = vld [vmem:[%s1927_s28 + $0x260] sm:$0xff]  ;;  %v399_v52 = vld [vmem:[%s1927_s28 + $0x250] sm:$0xff]  ;;  %v1328_v53 = vpack.c.bf16 %v404_v46, %v400_v45  ;;  %v406_v55 = vld [vmem:[%s1927_s28 + $0x288] sm:$0xff] }
  0x95   : > { %1317 = vmatprep.subr.bf16.mxu1 %v1316_v17  ;;  %v403_v54 = vld [vmem:[%s1927_s28 + $0x270] sm:$0xff]  ;;  %v410_v56 = vld [vmem:[%s1927_s28 + $0x2a8] sm:$0xff]  ;;  %v408_v57 = vld [vmem:[%s1927_s28 + $0x298] sm:$0xff]  ;;  %v1202_v59 = vpack.c.bf16 %v401_v51, %v397_v50 }
  0x96   : > { %v412_v58 = vld [vmem:[%s1927_s28 + $0x2b8] sm:$0xff]  ;;  %v1330_v60 = vpack.c.bf16 %v403_v54, %v399_v52  ;;  %v1204_v61 = vpack.c.bf16 %v410_v56, %v406_v55  ;;  %v405_v62 = vld [vmem:[%s1927_s28 + $0x280] sm:$0xff]  ;;  %v407_v0 = vld [vmem:[%s1927_s28 + $0x290] sm:$0xff] }
  0x97   : > { %1191 = vmatpush1.bf16.msra.mxu0 %v1190_v23  ;;  %v409_v63 = vld [vmem:[%s1927_s28 + $0x2a0] sm:$0xff]  ;;  %v1332_v1 = vpack.c.bf16 %v412_v58, %v408_v57  ;;  %v411_v2 = vld [vmem:[%s1927_s28 + $0x2b0] sm:$0xff]  ;;  %v414_v3 = vld [vmem:[%s1927_s28 + $0x2c8] sm:$0xff] }
  0x98   : > { %1319 = vmatpush1.bf16.msra.mxu1 %v1318_v24  ;;  %1193 = vmatprep.subr.bf16.mxu0 %v1192_v25  ;;  %v418_v4 = vld [vmem:[%s1927_s28 + $0x2e8] sm:$0xff]  ;;  %v416_v5 = vld [vmem:[%s1927_s28 + $0x2d8] sm:$0xff]  ;;  %v1206_v7 = vpack.c.bf16 %v409_v63, %v405_v62  ;;  %v413_v8 = vld [vmem:[%s1927_s28 + $0x2c0] sm:$0xff]  ;;  %v1334_v9 = vpack.c.bf16 %v411_v2, %v407_v0 }
  0x99   : > { %1321 = vmatprep.subr.bf16.mxu1 %v1320_v29  ;;  %v420_v6 = vld [vmem:[%s1927_s28 + $0x2f8] sm:$0xff]  ;;  %v1208_v10 = vpack.c.bf16 %v418_v4, %v414_v3  ;;  %v417_v11 = vld [vmem:[%s1927_s28 + $0x2e0] sm:$0xff]  ;;  %v415_v12 = vld [vmem:[%s1927_s28 + $0x2d0] sm:$0xff] }
  0x9a   : > { %v419_v13 = vld [vmem:[%s1927_s28 + $0x2f0] sm:$0xff]  ;;  %v1336_v14 = vpack.c.bf16 %v420_v6, %v416_v5  ;;  %v422_v15 = vld [vmem:[%s1927_s28 + $0x308] sm:$0xff]  ;;  %v424_v18 = vld [vmem:[%s1927_s28 + $0x318] sm:$0xff]  ;;  %v1210_v20 = vpack.c.bf16 %v417_v11, %v413_v8 }
  0x9b   : > { %1195 = vmatpush1.bf16.msra.mxu0 %v1194_v35  ;;  %v426_v16 = vld [vmem:[%s1927_s28 + $0x328] sm:$0xff]  ;;  %v428_v19 = vld [vmem:[%s1927_s28 + $0x338] sm:$0xff]  ;;  %v1338_v21 = vpack.c.bf16 %v419_v13, %v415_v12  ;;  %v421_v23 = vld [vmem:[%s1927_s28 + $0x300] sm:$0xff] }
  0x9c   : > { %1323 = vmatpush1.bf16.msra.mxu1 %v1322_v36  ;;  %1197 = vmatprep.subr.bf16.mxu0 %v1196_v37  ;;  %v314_v17 = vld [vmem:[#allocation3 + $0x8] sm:$0xff]  ;;  %v1212_v22 = vpack.c.bf16 %v426_v16, %v422_v15  ;;  %v425_v24 = vld [vmem:[%s1927_s28 + $0x320] sm:$0xff]  ;;  %v423_v25 = vld [vmem:[%s1927_s28 + $0x310] sm:$0xff]  ;;  %v1340_v26 = vpack.c.bf16 %v428_v19, %v424_v18 }
  0x9d   : > { %1325 = vmatprep.subr.bf16.mxu1 %v1324_v41  ;;  %645 = vmatprep.mubr.f32.mxu0 %v314_v17  ;;  %v427_v27 = vld [vmem:[%s1927_s28 + $0x330] sm:$0xff]  ;;  %v430_v28 = vld [vmem:[%s1927_s28 + $0x348] sm:$0xff]  ;;  %v432_v30 = vld [vmem:[%s1927_s28 + $0x358] sm:$0xff]  ;;  %v1214_v32 = vpack.c.bf16 %v425_v24, %v421_v23 }
  0x9e   : > { %811 = vmatprep.mubr.f32.mxu1 %v314_v17  ;;  %v434_v29 = vld [vmem:[%s1927_s28 + $0x368] sm:$0xff]  ;;  %v436_v31 = vld [vmem:[%s1927_s28 + $0x378] sm:$0xff]  ;;  %v1342_v33 = vpack.c.bf16 %v427_v27, %v423_v25  ;;  %v429_v35 = vld [vmem:[%s1927_s28 + $0x340] sm:$0xff] }
  0x9f   : > { %1199 = vmatpush1.bf16.msra.mxu0 %v1198_v47  ;;  %v1216_v34 = vpack.c.bf16 %v434_v29, %v430_v28  ;;  %v433_v36 = vld [vmem:[%s1927_s28 + $0x360] sm:$0xff]  ;;  %v431_v37 = vld [vmem:[%s1927_s28 + $0x350] sm:$0xff]  ;;  %v1344_v38 = vpack.c.bf16 %v436_v31, %v432_v30  ;;  %v438_v40 = vld [vmem:[%s1927_s28 + $0x388] sm:$0xff] }
  0xa0   : > { %1327 = vmatpush1.bf16.msra.mxu1 %v1326_v48  ;;  %1201 = vmatprep.subr.bf16.mxu0 %v1200_v49  ;;  %v435_v39 = vld [vmem:[%s1927_s28 + $0x370] sm:$0xff]  ;;  %v442_v41 = vld [vmem:[%s1927_s28 + $0x3a8] sm:$0xff]  ;;  %v440_v42 = vld [vmem:[%s1927_s28 + $0x398] sm:$0xff]  ;;  %v1218_v44 = vpack.c.bf16 %v433_v36, %v429_v35 }
  0xa1   : > { %1329 = vmatprep.subr.bf16.mxu1 %v1328_v53  ;;  %v444_v43 = vld [vmem:[%s1927_s28 + $0x3b8] sm:$0xff]  ;;  %v1346_v45 = vpack.c.bf16 %v435_v39, %v431_v37  ;;  %v1220_v46 = vpack.c.bf16 %v442_v41, %v438_v40  ;;  %v437_v47 = vld [vmem:[%s1927_s28 + $0x380] sm:$0xff]  ;;  %v439_v49 = vld [vmem:[%s1927_s28 + $0x390] sm:$0xff] }
  0xa2   : > { %v441_v48 = vld [vmem:[%s1927_s28 + $0x3a0] sm:$0xff]  ;;  %v1348_v50 = vpack.c.bf16 %v444_v43, %v440_v42  ;;  %v443_v51 = vld [vmem:[%s1927_s28 + $0x3b0] sm:$0xff]  ;;  %v446_v52 = vld [vmem:[%s1927_s28 + $0x3c8] sm:$0xff] }
  0xa3   : > { %1203 = vmatpush1.bf16.msra.mxu0 %v1202_v59  ;;  %v450_v53 = vld [vmem:[%s1927_s28 + $0x3e8] sm:$0xff]  ;;  %v448_v54 = vld [vmem:[%s1927_s28 + $0x3d8] sm:$0xff]  ;;  %v1222_v56 = vpack.c.bf16 %v441_v48, %v437_v47  ;;  %v1350_v57 = vpack.c.bf16 %v443_v51, %v439_v49  ;;  %v445_v59 = vld [vmem:[%s1927_s28 + $0x3c0] sm:$0xff] }
  0xa4   : > { %1331 = vmatpush1.bf16.msra.mxu1 %v1330_v60  ;;  %1205 = vmatprep.subr.bf16.mxu0 %v1204_v61  ;;  %v452_v55 = vld [vmem:[%s1927_s28 + $0x3f8] sm:$0xff]  ;;  %v1224_v58 = vpack.c.bf16 %v450_v53, %v446_v52  ;;  %v449_v60 = vld [vmem:[%s1927_s28 + $0x3e0] sm:$0xff]  ;;  %v447_v61 = vld [vmem:[%s1927_s28 + $0x3d0] sm:$0xff] }
  0xa5   : > { %1333 = vmatprep.subr.bf16.mxu1 %v1332_v1  ;;  %v1352_v62 = vpack.c.bf16 %v452_v55, %v448_v54  ;;  %v451_v63 = vld [vmem:[%s1927_s28 + $0x3f0] sm:$0xff]  ;;  %v454_v0 = vld [vmem:[%s1927_s28 + $0x408] sm:$0xff]  ;;  %v456_v2 = vld [vmem:[%s1927_s28 + $0x418] sm:$0xff]  ;;  %v1226_v4 = vpack.c.bf16 %v449_v60, %v445_v59 }
  0xa6   : > { %v458_v1 = vld [vmem:[%s1927_s28 + $0x428] sm:$0xff]  ;;  %v460_v3 = vld [vmem:[%s1927_s28 + $0x438] sm:$0xff]  ;;  %v1354_v5 = vpack.c.bf16 %v451_v63, %v447_v61  ;;  %v457_v8 = vld [vmem:[%s1927_s28 + $0x420] sm:$0xff] }
  0xa7   : > { %1207 = vmatpush1.bf16.msra.mxu0 %v1206_v7  ;;  %v1228_v6 = vpack.c.bf16 %v458_v1, %v454_v0  ;;  %v453_v7 = vld [vmem:[%s1927_s28 + $0x400] sm:$0xff]  ;;  %v459_v11 = vld [vmem:[%s1927_s28 + $0x430] sm:$0xff]  ;;  %v462_v12 = vld [vmem:[%s1927_s28 + $0x448] sm:$0xff] }
  0xa8   : > { %1335 = vmatpush1.bf16.msra.mxu1 %v1334_v9  ;;  %1209 = vmatprep.subr.bf16.mxu0 %v1208_v10  ;;  %v455_v9 = vld [vmem:[%s1927_s28 + $0x410] sm:$0xff]  ;;  %v1356_v10 = vpack.c.bf16 %v460_v3, %v456_v2  ;;  %v466_v13 = vld [vmem:[%s1927_s28 + $0x468] sm:$0xff]  ;;  %v468_v15 = vld [vmem:[%s1927_s28 + $0x478] sm:$0xff]  ;;  %v1230_v17 = vpack.c.bf16 %v457_v8, %v453_v7 }
  0xa9   : > { %1337 = vmatprep.subr.bf16.mxu1 %v1336_v14  ;;  %v464_v14 = vld [vmem:[%s1927_s28 + $0x458] sm:$0xff]  ;;  %v313_v16 = vld [vmem:[#allocation3] sm:$0xff]  ;;  %v1358_v18 = vpack.c.bf16 %v459_v11, %v455_v9  ;;  %v1232_v19 = vpack.c.bf16 %v466_v13, %v462_v12  ;;  %v467_v24 = vld [vmem:[%s1927_s28 + $0x470] sm:$0xff] }
  0xaa   : > { %v1360_v23 = vpack.c.bf16 %v468_v15, %v464_v14  ;;  %v470_v25 = vld [vmem:[%s1927_s28 + $0x488] sm:$0xff]  ;;  %v472_v27 = vld [vmem:[%s1927_s28 + $0x498] sm:$0xff]  ;;  %v475_v36 = vld [vmem:[%s1927_s28 + $0x4b0] sm:$0xff] }
  0xab   : > { %1211 = vmatpush1.bf16.msra.mxu0 %v1210_v20  ;;  %v461_v20 = vld [vmem:[%s1927_s28 + $0x440] sm:$0xff]  ;;  %v476_v28 = vld [vmem:[%s1927_s28 + $0x4b8] sm:$0xff]  ;;  %v478_v37 = vld [vmem:[%s1927_s28 + $0x4c8] sm:$0xff] }
  0xac   : > { %1339 = vmatpush1.bf16.msra.mxu1 %v1338_v21  ;;  %1213 = vmatprep.subr.bf16.mxu0 %v1212_v22  ;;  %v465_v21 = vld [vmem:[%s1927_s28 + $0x460] sm:$0xff]  ;;  %v463_v22 = vld [vmem:[%s1927_s28 + $0x450] sm:$0xff]  ;;  %v1364_v35 = vpack.c.bf16 %v476_v28, %v472_v27  ;;  %v480_v39 = vld [vmem:[%s1927_s28 + $0x4d8] sm:$0xff] }
  0xad   : > { %1341 = vmatprep.subr.bf16.mxu1 %v1340_v26  ;;  %v474_v26 = vld [vmem:[%s1927_s28 + $0x4a8] sm:$0xff]  ;;  %v1234_v29 = vpack.c.bf16 %v465_v21, %v461_v20  ;;  %v1362_v30 = vpack.c.bf16 %v467_v24, %v463_v22  ;;  %v484_v40 = vld [vmem:[%s1927_s28 + $0x4f8] sm:$0xff]  ;;  %v483_v48 = vld [vmem:[%s1927_s28 + $0x4f0] sm:$0xff] }
  0xae   : > { %v1236_v31 = vpack.c.bf16 %v474_v26, %v470_v25  ;;  %v1368_v47 = vpack.c.bf16 %v484_v40, %v480_v39  ;;  %v486_v49 = vld [vmem:[%s1927_s28 + $0x508] sm:$0xff]  ;;  %v488_v51 = vld [vmem:[%s1927_s28 + $0x518] sm:$0xff]  ;;  %v491_v60 = vld [vmem:[%s1927_s28 + $0x530] sm:$0xff] }
  0xaf   : > { %1215 = vmatpush1.bf16.msra.mxu0 %v1214_v32  ;;  %v469_v32 = vld [vmem:[%s1927_s28 + $0x480] sm:$0xff]  ;;  %v492_v52 = vld [vmem:[%s1927_s28 + $0x538] sm:$0xff]  ;;  %v494_v61 = vld [vmem:[%s1927_s28 + $0x548] sm:$0xff] }
  0xb0   : > { %1343 = vmatpush1.bf16.msra.mxu1 %v1342_v33  ;;  %1217 = vmatprep.subr.bf16.mxu0 %v1216_v34  ;;  %v473_v33 = vld [vmem:[%s1927_s28 + $0x4a0] sm:$0xff]  ;;  %v471_v34 = vld [vmem:[%s1927_s28 + $0x490] sm:$0xff]  ;;  %v1372_v59 = vpack.c.bf16 %v492_v52, %v488_v51  ;;  %v496_v63 = vld [vmem:[%s1927_s28 + $0x558] sm:$0xff] }
  0xb1   : > { %1345 = vmatprep.subr.bf16.mxu1 %v1344_v38  ;;  %v482_v38 = vld [vmem:[%s1927_s28 + $0x4e8] sm:$0xff]  ;;  %v1238_v41 = vpack.c.bf16 %v473_v33, %v469_v32  ;;  %v1366_v42 = vpack.c.bf16 %v475_v36, %v471_v34  ;;  %v500_v0 = vld [vmem:[%s1927_s28 + $0x578] sm:$0xff]  ;;  %v493_v2 = vld [vmem:[%s1927_s28 + $0x540] sm:$0xff] }
  0xb2   : > { %v1240_v43 = vpack.c.bf16 %v482_v38, %v478_v37  ;;  %v318_v3 = vld [vmem:[#allocation3 + $0x28] sm:$0xff]  ;;  %v495_v7 = vld [vmem:[%s1927_s28 + $0x550] sm:$0xff]  ;;  %v317_v8 = vld [vmem:[#allocation3 + $0x20] sm:$0xff]  ;;  %v1376_v9 = vpack.c.bf16 %v500_v0, %v496_v63 }
  0xb3   : > { %1219 = vmatpush1.bf16.msra.mxu0 %v1218_v44  ;;  %v477_v44 = vld [vmem:[%s1927_s28 + $0x4c0] sm:$0xff]  ;;  %v502_v11 = vld [vmem:[%s1927_s28 + $0x588] sm:$0xff]  ;;  %v504_v13 = vld [vmem:[%s1927_s28 + $0x598] sm:$0xff] }
  0xb4   : > { %1347 = vmatpush1.bf16.msra.mxu1 %v1346_v45  ;;  %1221 = vmatprep.subr.bf16.mxu0 %v1220_v46  ;;  %v481_v45 = vld [vmem:[%s1927_s28 + $0x4e0] sm:$0xff]  ;;  %v479_v46 = vld [vmem:[%s1927_s28 + $0x4d0] sm:$0xff]  ;;  %v506_v12 = vld [vmem:[%s1927_s28 + $0x5a8] sm:$0xff] }
  0xb5   : > { %1349 = vmatprep.subr.bf16.mxu1 %v1348_v50  ;;  %v490_v50 = vld [vmem:[%s1927_s28 + $0x528] sm:$0xff]  ;;  %v1242_v53 = vpack.c.bf16 %v481_v45, %v477_v44  ;;  %v1370_v54 = vpack.c.bf16 %v483_v48, %v479_v46  ;;  %v508_v14 = vld [vmem:[%s1927_s28 + $0x5b8] sm:$0xff]  ;;  %v501_v20 = vld [vmem:[%s1927_s28 + $0x580] sm:$0xff] }
  0xb6   : > { %v1244_v55 = vpack.c.bf16 %v490_v50, %v486_v49  ;;  %v505_v21 = vld [vmem:[%s1927_s28 + $0x5a0] sm:$0xff]  ;;  %v503_v22 = vld [vmem:[%s1927_s28 + $0x590] sm:$0xff]  ;;  %v510_v25 = vld [vmem:[%s1927_s28 + $0x5c8] sm:$0xff] }
  0xb7   : > { %1223 = vmatpush1.bf16.msra.mxu0 %v1222_v56  ;;  %v485_v56 = vld [vmem:[%s1927_s28 + $0x500] sm:$0xff]  ;;  %v507_v24 = vld [vmem:[%s1927_s28 + $0x5b0] sm:$0xff]  ;;  %v514_v26 = vld [vmem:[%s1927_s28 + $0x5e8] sm:$0xff] }
  0xb8   : > { %1351 = vmatpush1.bf16.msra.mxu1 %v1350_v57  ;;  %1225 = vmatprep.subr.bf16.mxu0 %v1224_v58  ;;  %v489_v57 = vld [vmem:[%s1927_s28 + $0x520] sm:$0xff]  ;;  %v487_v58 = vld [vmem:[%s1927_s28 + $0x510] sm:$0xff]  ;;  %v512_v27 = vld [vmem:[%s1927_s28 + $0x5d8] sm:$0xff]  ;;  %v1256_v32 = vpack.c.bf16 %v514_v26, %v510_v25 }
  0xb9   : > { %1353 = vmatprep.subr.bf16.mxu1 %v1352_v62  ;;  %v498_v62 = vld [vmem:[%s1927_s28 + $0x568] sm:$0xff]  ;;  %v1246_v1 = vpack.c.bf16 %v489_v57, %v485_v56  ;;  %v516_v28 = vld [vmem:[%s1927_s28 + $0x5f8] sm:$0xff]  ;;  %v509_v33 = vld [vmem:[%s1927_s28 + $0x5c0] sm:$0xff] }
  0xba   : > { %v513_v34 = vld [vmem:[%s1927_s28 + $0x5e0] sm:$0xff]  ;;  %v1384_v36 = vpack.c.bf16 %v516_v28, %v512_v27  ;;  %v515_v37 = vld [vmem:[%s1927_s28 + $0x5f0] sm:$0xff]  ;;  %v518_v38 = vld [vmem:[%s1927_s28 + $0x608] sm:$0xff] }
  0xbb   : > { %1227 = vmatpush1.bf16.msra.mxu0 %v1226_v4  ;;  %v1374_v4 = vpack.c.bf16 %v491_v60, %v487_v58  ;;  %v522_v39 = vld [vmem:[%s1927_s28 + $0x628] sm:$0xff]  ;;  %v520_v40 = vld [vmem:[%s1927_s28 + $0x618] sm:$0xff]  ;;  %v517_v45 = vld [vmem:[%s1927_s28 + $0x600] sm:$0xff] }
  0xbc   : > { %1355 = vmatpush1.bf16.msra.mxu1 %v1354_v5  ;;  %1229 = vmatprep.subr.bf16.mxu0 %v1228_v6  ;;  %v1248_v5 = vpack.c.bf16 %v498_v62, %v494_v61  ;;  %v497_v6 = vld [vmem:[%s1927_s28 + $0x560] sm:$0xff]  ;;  %v1260_v44 = vpack.c.bf16 %v522_v39, %v518_v38  ;;  %v523_v49 = vld [vmem:[%s1927_s28 + $0x630] sm:$0xff]  ;;  %v526_v50 = vld [vmem:[%s1927_s28 + $0x648] sm:$0xff] }
  0xbd   : > { %1357 = vmatprep.subr.bf16.mxu1 %v1356_v10  ;;  %v499_v10 = vld [vmem:[%s1927_s28 + $0x570] sm:$0xff]  ;;  %v1250_v15 = vpack.c.bf16 %v497_v6, %v493_v2  ;;  %v521_v46 = vld [vmem:[%s1927_s28 + $0x620] sm:$0xff]  ;;  %v530_v51 = vld [vmem:[%s1927_s28 + $0x668] sm:$0xff] }
  0xbe   : > { %646 = vmatmul.mubr.f32.vlgmr.msra.gmra.mrb[0].mxu0 %v313_v16  ;;  %v528_v52 = vld [vmem:[%s1927_s28 + $0x658] sm:$0xff]  ;;  %v1264_v56 = vpack.c.bf16 %v530_v51, %v526_v50  ;;  %v525_v57 = vld [vmem:[%s1927_s28 + $0x640] sm:$0xff]  ;;  %v531_v61 = vld [vmem:[%s1927_s28 + $0x670] sm:$0xff] }
  0xbf   : > { %1231 = vmatpush1.bf16.msra.mxu0 %v1230_v17  ;;  %812 = vmatmul.mubr.f32.vlgmr.msra.gmra.mrb[0].mxu1 %v313_v16  ;;  %v322_v16 = vld [vmem:[#allocation3 + $0x48] sm:$0xf]  ;;  %v321_v17 = vld [vmem:[#allocation3 + $0x40] sm:$0xf]  ;;  %v536_v0 = vld [vmem:[%s1927_s28 + $0x698] sm:$0xff] }
  0xc0   : > { %1359 = vmatpush1.bf16.msra.mxu1 %v1358_v18  ;;  %1233 = vmatprep.subr.bf16.mxu0 %v1232_v19  ;;  %v1378_v18 = vpack.c.bf16 %v499_v10, %v495_v7  ;;  %v1252_v19 = vpack.c.bf16 %v506_v12, %v502_v11  ;;  %v529_v58 = vld [vmem:[%s1927_s28 + $0x660] sm:$0xff]  ;;  %v534_v62 = vld [vmem:[%s1927_s28 + $0x688] sm:$0xff]  ;;  %v535_v7 = vld [vmem:[%s1927_s28 + $0x690] sm:$0xff] }
  0xc1   : > { %1361 = vmatprep.subr.bf16.mxu1 %v1360_v23  ;;  %651 = vmatprep.mubr.f32.mxu0 %v318_v3  ;;  %v1380_v23 = vpack.c.bf16 %v508_v14, %v504_v13  ;;  %v538_v63 = vld [vmem:[%s1927_s28 + $0x6a8] sm:$0xff]  ;;  %v1266_v2 = vpack.c.bf16 %v529_v58, %v525_v57  ;;  %v537_v6 = vld [vmem:[%s1927_s28 + $0x6a0] sm:$0xff]  ;;  %v544_v12 = vld [vmem:[%s1927_s28 + $0x6d8] sm:$0xff] }
  0xc2   : > { %817 = vmatprep.mubr.f32.mxu1 %v318_v3  ;;  %652 = vmatmul.mubr.f32.gmra.mrb[2].mxu0 %v317_v8  ;;  %v542_v10 = vld [vmem:[%s1927_s28 + $0x6c8] sm:$0xff]  ;;  %v548_v13 = vld [vmem:[%s1927_s28 + $0x6f8] sm:$0xff]  ;;  %v571_v57 = vld [vmem:[%s1927_s28 + $0x7b0] sm:$0xff] }
  0xc3   : > { %1235 = vmatpush1.bf16.msra.mxu0 %v1234_v29  ;;  %818 = vmatmul.mubr.f32.gmra.mrb[2].mxu1 %v317_v8  ;;  %v316_v29 = vld [vmem:[#allocation3 + $0x18] sm:$0xff]  ;;  %v546_v11 = vld [vmem:[%s1927_s28 + $0x6e8] sm:$0xff] }
  0xc4   : > { %1363 = vmatpush1.bf16.msra.mxu1 %v1362_v30  ;;  %1237 = vmatprep.subr.bf16.mxu0 %v1236_v31  ;;  %v1254_v30 = vpack.c.bf16 %v505_v21, %v501_v20  ;;  %v1382_v31 = vpack.c.bf16 %v507_v24, %v503_v22  ;;  %v1400_v20 = vpack.c.bf16 %v548_v13, %v544_v12  ;;  %v547_v21 = vld [vmem:[%s1927_s28 + $0x6f0] sm:$0xff]  ;;  %v550_v22 = vld [vmem:[%s1927_s28 + $0x708] sm:$0xff]  ;;  %v552_v24 = vld [vmem:[%s1927_s28 + $0x718] sm:$0xff]  ;;  %v954_v13 = vlaneseq }
  0xc5   : > { %1365 = vmatprep.subr.bf16.mxu1 %v1364_v35  ;;  %657 = vmatprep.mubr.f32.mxu0 %v322_v16  ;;  %v511_v35 = vld [vmem:[%s1927_s28 + $0x5d0] sm:$0xff]  ;;  %v556_v25 = vld [vmem:[%s1927_s28 + $0x738] sm:$0xff]  ;;  %v574_v58 = vld [vmem:[%s1927_s28 + $0x7c8] sm:$0xff] }
  0xc6   : > { %823 = vmatprep.mubr.f32.mxu1 %v322_v16  ;;  %658 = vmatmul.mubr.f32.gmra.mrb[4].mxu0 %v321_v17  ;;  %v1272_v16 = vpack.c.bf16 %v546_v11, %v542_v10  ;;  %v319_v10 = vld [vmem:[#allocation3 + $0x30] sm:$0xff]  ;;  %v324_v11 = vld [vmem:[#allocation3 + $0x58] sm:$0xf] }
  0xc7   : > { %1239 = vmatpush1.bf16.msra.mxu0 %v1238_v41  ;;  %824 = vmatmul.mubr.f32.gmra.mrb[4].mxu1 %v321_v17  ;;  %v524_v41 = vld [vmem:[%s1927_s28 + $0x638] sm:$0xff]  ;;  %v541_v17 = vld [vmem:[%s1927_s28 + $0x6c0] sm:$0xff]  ;;  %v323_v12 = vld [vmem:[#allocation3 + $0x50] sm:$0xf] }
  0xc8   : > { %1367 = vmatpush1.bf16.msra.mxu1 %v1366_v42  ;;  %1241 = vmatprep.subr.bf16.mxu0 %v1240_v43  ;;  %v1258_v42 = vpack.c.bf16 %v513_v34, %v509_v33  ;;  %v1386_v43 = vpack.c.bf16 %v515_v37, %v511_v35  ;;  %v1388_v48 = vpack.c.bf16 %v524_v41, %v520_v40  ;;  %v555_v33 = vld [vmem:[%s1927_s28 + $0x730] sm:$0xff]  ;;  %v558_v34 = vld [vmem:[%s1927_s28 + $0x748] sm:$0xff]  ;;  %v564_v37 = vld [vmem:[%s1927_s28 + $0x778] sm:$0xff] }
  0xc9   : > { %1369 = vmatprep.subr.bf16.mxu1 %v1368_v47  ;;  %728 = vmatprep.mubr.f32.mxu0 %v316_v29  ;;  %v519_v47 = vld [vmem:[%s1927_s28 + $0x610] sm:$0xff]  ;;  %v562_v35 = vld [vmem:[%s1927_s28 + $0x768] sm:$0xff]  ;;  %v557_v41 = vld [vmem:[%s1927_s28 + $0x740] sm:$0xff] }
  0xca   : > { %894 = vmatprep.mubr.f32.mxu1 %v316_v29  ;;  %v549_v29 = vld [vmem:[%s1927_s28 + $0x700] sm:$0xff]  ;;  %v1280_v40 = vpack.c.bf16 %v562_v35, %v558_v34 }
  0xcb   : > { %1243 = vmatpush1.bf16.msra.mxu0 %v1242_v53  ;;  %v532_v53 = vld [vmem:[%s1927_s28 + $0x678] sm:$0xff] }
  0xcc   : > { %1371 = vmatpush1.bf16.msra.mxu1 %v1370_v54  ;;  %1245 = vmatprep.subr.bf16.mxu0 %v1244_v55  ;;  %v1262_v54 = vpack.c.bf16 %v521_v46, %v517_v45  ;;  %v1390_v55 = vpack.c.bf16 %v523_v49, %v519_v47  ;;  %v1392_v60 = vpack.c.bf16 %v532_v53, %v528_v52  ;;  %v563_v45 = vld [vmem:[%s1927_s28 + $0x770] sm:$0xff]  ;;  %v566_v46 = vld [vmem:[%s1927_s28 + $0x788] sm:$0xff]  ;;  %v572_v49 = vld [vmem:[%s1927_s28 + $0x7b8] sm:$0xff] }
  0xcd   : > { %1373 = vmatprep.subr.bf16.mxu1 %v1372_v59  ;;  %v527_v59 = vld [vmem:[%s1927_s28 + $0x650] sm:$0xff]  ;;  %v570_v47 = vld [vmem:[%s1927_s28 + $0x7a8] sm:$0xff]  ;;  %v565_v53 = vld [vmem:[%s1927_s28 + $0x780] sm:$0xff] }
  0xce   : > { %v1394_v3 = vpack.c.bf16 %v531_v61, %v527_v59  ;;  %v1284_v52 = vpack.c.bf16 %v570_v47, %v566_v46  ;;  %v578_v59 = vld [vmem:[%s1927_s28 + $0x7e8] sm:$0xff]  ;;  %v580_v61 = vld [vmem:[%s1927_s28 + $0x7f8] sm:$0xff] }
  0xcf   : > { %1247 = vmatpush1.bf16.msra.mxu0 %v1246_v1  ;;  %v540_v1 = vld [vmem:[%s1927_s28 + $0x6b8] sm:$0xff] }
  0xd0   : > { %1375 = vmatpush1.bf16.msra.mxu1 %v1374_v4  ;;  %1249 = vmatprep.subr.bf16.mxu0 %v1248_v5  ;;  %v1268_v4 = vpack.c.bf16 %v538_v63, %v534_v62  ;;  %v533_v5 = vld [vmem:[%s1927_s28 + $0x680] sm:$0xff]  ;;  %v1396_v8 = vpack.c.bf16 %v540_v1, %v536_v0  ;;  %v1288_v0 = vpack.c.bf16 %v578_v59, %v574_v58 }
  0xd1   : > { %1377 = vmatprep.subr.bf16.mxu1 %v1376_v9  ;;  %v539_v9 = vld [vmem:[%s1927_s28 + $0x6b0] sm:$0xff]  ;;  %v1270_v14 = vpack.c.bf16 %v537_v6, %v533_v5  ;;  %v573_v1 = vld [vmem:[%s1927_s28 + $0x7c0] sm:$0xff] }
  0xd2   : > { %v579_v5 = vld [vmem:[%s1927_s28 + $0x7f0] sm:$0xff] }
  0xd3   : > { %1251 = vmatpush1.bf16.msra.mxu0 %v1250_v15  ;;  %v1398_v15 = vpack.c.bf16 %v539_v9, %v535_v7  ;;  %v320_v9 = vld [vmem:[#allocation3 + $0x38] sm:$0xff] }
  0xd4   : > { %1379 = vmatpush1.bf16.msra.mxu1 %v1378_v18  ;;  %1253 = vmatprep.subr.bf16.mxu0 %v1252_v19  ;;  %v545_v18 = vld [vmem:[%s1927_s28 + $0x6e0] sm:$0xff]  ;;  %v543_v19 = vld [vmem:[%s1927_s28 + $0x6d0] sm:$0xff] }
  0xd5   : > { %1381 = vmatprep.subr.bf16.mxu1 %v1380_v23  ;;  %v554_v23 = vld [vmem:[%s1927_s28 + $0x728] sm:$0xff]  ;;  %v1274_v26 = vpack.c.bf16 %v545_v18, %v541_v17  ;;  %v1402_v27 = vpack.c.bf16 %v547_v21, %v543_v19 }
  0xd6   : > { %v1276_v28 = vpack.c.bf16 %v554_v23, %v550_v22 }
  0xd7   : > { %1255 = vmatpush1.bf16.msra.mxu0 %v1254_v30  ;;  %v553_v30 = vld [vmem:[%s1927_s28 + $0x720] sm:$0xff] }
  0xd8   : > { %1383 = vmatpush1.bf16.msra.mxu1 %v1382_v31  ;;  %1257 = vmatprep.subr.bf16.mxu0 %v1256_v32  ;;  %v551_v31 = vld [vmem:[%s1927_s28 + $0x710] sm:$0xff]  ;;  %v1404_v32 = vpack.c.bf16 %v556_v25, %v552_v24  ;;  %v1278_v38 = vpack.c.bf16 %v553_v30, %v549_v29 }
  0xd9   : > { %1385 = vmatprep.subr.bf16.mxu1 %v1384_v36  ;;  %v560_v36 = vld [vmem:[%s1927_s28 + $0x758] sm:$0xff]  ;;  %v1406_v39 = vpack.c.bf16 %v555_v33, %v551_v31 }
  0xdb   : > { %1259 = vmatpush1.bf16.msra.mxu0 %v1258_v42  ;;  %v561_v42 = vld [vmem:[%s1927_s28 + $0x760] sm:$0xff] }
  0xdc   : > { %1387 = vmatpush1.bf16.msra.mxu1 %v1386_v43  ;;  %1261 = vmatprep.subr.bf16.mxu0 %v1260_v44  ;;  %v559_v43 = vld [vmem:[%s1927_s28 + $0x750] sm:$0xff]  ;;  %v1408_v44 = vpack.c.bf16 %v564_v37, %v560_v36  ;;  %v1282_v50 = vpack.c.bf16 %v561_v42, %v557_v41  ;;  %v309_v36 = vld [vmem:[#allocation2 + $0x40] sm:$0xf] }
  0xdd   : > { %1389 = vmatprep.subr.bf16.mxu1 %v1388_v48  ;;  %v568_v48 = vld [vmem:[%s1927_s28 + $0x798] sm:$0xff]  ;;  %v1410_v51 = vpack.c.bf16 %v563_v45, %v559_v43 }
  0xde   : > { %v312_v43 = vld [vmem:[#allocation2 + $0x58] sm:$0xf] }
  0xdf   : > { %1263 = vmatpush1.bf16.msra.mxu0 %v1262_v54  ;;  %v569_v54 = vld [vmem:[%s1927_s28 + $0x7a0] sm:$0xff] }
  0xe0   : > { %1391 = vmatpush1.bf16.msra.mxu1 %v1390_v55  ;;  %1265 = vmatprep.subr.bf16.mxu0 %v1264_v56  ;;  %v567_v55 = vld [vmem:[%s1927_s28 + $0x790] sm:$0xff]  ;;  %v1412_v56 = vpack.c.bf16 %v572_v49, %v568_v48  ;;  %v1286_v62 = vpack.c.bf16 %v569_v54, %v565_v53 }
  0xe1   : > { %1393 = vmatprep.subr.bf16.mxu1 %v1392_v60  ;;  %v576_v60 = vld [vmem:[%s1927_s28 + $0x7d8] sm:$0xff]  ;;  %v1414_v63 = vpack.c.bf16 %v571_v57, %v567_v55 }
  0xe3   : > { %1267 = vmatpush1.bf16.msra.mxu0 %v1266_v2  ;;  %v577_v2 = vld [vmem:[%s1927_s28 + $0x7e0] sm:$0xff] }
  0xe4   : > { %1395 = vmatpush1.bf16.msra.mxu1 %v1394_v3  ;;  %1269 = vmatprep.subr.bf16.mxu0 %v1268_v4  ;;  %v1416_v3 = vpack.c.bf16 %v580_v61, %v576_v60  ;;  %v575_v4 = vld [vmem:[%s1927_s28 + $0x7d0] sm:$0xff]  ;;  %v1290_v6 = vpack.c.bf16 %v577_v2, %v573_v1 }
  0xe5   : > { %1397 = vmatprep.subr.bf16.mxu1 %v1396_v8  ;;  %v1418_v7 = vpack.c.bf16 %v579_v5, %v575_v4  ;;  %v315_v8 = vld [vmem:[#allocation3 + $0x10] sm:$0xff] }
  0xe7   : > { %1271 = vmatpush1.bf16.msra.mxu0 %v1270_v14  ;;  %v955_v14 = vshrl.u32 %v954_v13, 7 }
  0xe8   : > { %1399 = vmatpush1.bf16.msra.mxu1 %v1398_v15  ;;  %1273 = vmatprep.subr.bf16.mxu0 %v1272_v16  ;;  %v952_v16 = vld [vmem:[%s250_s8] sm:$0xf] }
  0xe9   : > { %1401 = vmatprep.subr.bf16.mxu1 %v1400_v20  ;;  %v956_v15 = vsub.s32 0, %v955_v14  ;;  %v964_v17 = vsub.s32 2, %v955_v14  ;;  %v960_v18 = vsub.s32 1, %v955_v14  ;;  %v968_v19 = vsub.s32 3, %v955_v14 }
  0xeb   : > { %1275 = vmatpush1.bf16.msra.mxu0 %v1274_v26  ;;  %v957_v20 = vrot.slane %v952_v16, %v956_v15  ;;  %v965_v22 = vrot.slane %v952_v16, %v964_v17  ;;  %v961_v23 = vrot.slane %v952_v16, %v960_v18  ;;  %v969_v26 = vrot.slane %v952_v16, %v968_v19 }
  0xec   : > { %1403 = vmatpush1.bf16.msra.mxu1 %v1402_v27  ;;  %1277 = vmatprep.subr.bf16.mxu0 %v1276_v28 }
  0xed   : > { %1405 = vmatprep.subr.bf16.mxu1 %v1404_v32 }
  0xef   : > { %1279 = vmatpush1.bf16.msra.mxu0 %v1278_v38  ;;  %v311_v38 = vld [vmem:[#allocation2 + $0x50] sm:$0xf] }
  0xf0   : > { %1407 = vmatpush1.bf16.msra.mxu1 %v1406_v39  ;;  %1281 = vmatprep.subr.bf16.mxu0 %v1280_v40  ;;  %v310_v39 = vld [vmem:[#allocation2 + $0x48] sm:$0xf] }
  0xf1   : > { %1409 = vmatprep.subr.bf16.mxu1 %v1408_v44 }
  0xf3   : > { %1283 = vmatpush1.bf16.msra.mxu0 %v1282_v50 }
  0xf4   : > { %1411 = vmatpush1.bf16.msra.mxu1 %v1410_v51  ;;  %1285 = vmatprep.subr.bf16.mxu0 %v1284_v52 }
  0xf5   : > { %1413 = vmatprep.subr.bf16.mxu1 %v1412_v56 }
  0xf7   : > { %1287 = vmatpush1.bf16.msra.mxu0 %v1286_v62 }
  0xf8   : > { %1415 = vmatpush1.bf16.msra.mxu1 %v1414_v63  ;;  %1289 = vmatprep.subr.bf16.mxu0 %v1288_v0 }
  0xf9   : > { %1417 = vmatprep.subr.bf16.mxu1 %v1416_v3 }
  0xfb   : > { %1291 = vmatpush1.bf16.msra.mxu0 %v1290_v6 }
  0xfc   : > { %1419 = vmatpush1.bf16.msra.mxu1 %v1418_v7 }
  0xfe   : > { %729 = vmatmul.mubr.f32.vlgmr.msra.gmra.mrb[0].mxu0 %v315_v8 }
  0xff   : > { %895 = vmatmul.mubr.f32.vlgmr.msra.gmra.mrb[0].mxu1 %v315_v8  ;;  %734 = vmatprep.mubr.f32.mxu0 %v320_v9 }
 0x100   : > { %900 = vmatprep.mubr.f32.mxu1 %v320_v9 }
 0x102   : > { %735 = vmatmul.mubr.f32.gmra.mrb[2].mxu0 %v319_v10 }
 0x103   : > { %901 = vmatmul.mubr.f32.gmra.mrb[2].mxu1 %v319_v10  ;;  %740 = vmatprep.mubr.f32.mxu0 %v324_v11 }
 0x104   : > { %906 = vmatprep.mubr.f32.mxu1 %v324_v11 }
 0x106   : > { %741 = vmatmul.mubr.f32.gmra.mrb[4].mxu0 %v323_v12 }
 0x107   : > { %907 = vmatmul.mubr.f32.gmra.mrb[4].mxu1 %v323_v12 }
 0x1d1   : > { %v730_v21 = vpop.f32.mrb[0].mxu0 }
 0x1d2   : > { %v896_v24 = vpop.f32.mrb[0].mxu1  ;;  %v732_v25 = vpop.f32.mrb[1].mxu0  ;;  %v974_v28 = vadd.f32 %v957_v20, %v730_v21 }
 0x1d3   : > { %v898_v27 = vpop.f32.mrb[1].mxu1  ;;  %v976_v29 = vadd.f32 %v965_v22, %v896_v24  ;;  %v975_v30 = vadd.f32 %v961_v23, %v732_v25 }
 0x1d4   : > { %986 = vst [vmem:[%s2191_s19] sm:$0xff] %v974_v28  ;;  %v977_v32 = vadd.f32 %v969_v26, %v898_v27 }
 0x1d5   : > { %v736_v31 = vpop.f32.mrb[2].mxu0  ;;  %988 = vst [vmem:[%s2191_s19 + $0x10] sm:$0xff] %v976_v29  ;;  %987 = vst [vmem:[%s2191_s19 + $0x8] sm:$0xff] %v975_v30 }
 0x1d6   : > { %v902_v33 = vpop.f32.mrb[2].mxu1  ;;  %v738_v34 = vpop.f32.mrb[3].mxu0  ;;  %989 = vst [vmem:[%s2191_s19 + $0x18] sm:$0xff] %v977_v32  ;;  %v978_v37 = vadd.f32 %v957_v20, %v736_v31 }
 0x1d7   : > { %v904_v35 = vpop.f32.mrb[3].mxu1  ;;  %v980_v40 = vadd.f32 %v965_v22, %v902_v33  ;;  %v979_v41 = vadd.f32 %v961_v23, %v738_v34 }
 0x1d8   : > { %990 = vst [vmem:[%s2191_s19 + $0x20] sm:$0xff] %v978_v37  ;;  %v981_v44 = vadd.f32 %v969_v26, %v904_v35 }
 0x1d9   : > { %v742_v42 = vpop.f32.mrb[4].mxu0  ;;  %992 = vst [vmem:[%s2191_s19 + $0x30] sm:$0xff] %v980_v40  ;;  %991 = vst [vmem:[%s2191_s19 + $0x28] sm:$0xff] %v979_v41 }
 0x1da   : > { %v921_v45 = vadd.f32 %v742_v42, %v309_v36  ;;  %v908_v46 = vpop.f32.mrb[4].mxu1  ;;  %v744_v47 = vpop.f32.mrb[5].mxu0  ;;  %993 = vst [vmem:[%s2191_s19 + $0x38] sm:$0xff] %v981_v44 }
 0x1db   : > { %v923_v48 = vadd.f32 %v908_v46, %v311_v38  ;;  %v922_v49 = vadd.f32 %v744_v47, %v310_v39  ;;  %v910_v50 = vpop.f32.mrb[5].mxu1 }
 0x1dc   : > { %933 = vst [vmem:[#allocation2 + $0x40] sm:$0xf] %v921_v45  ;;  %v924_v51 = vadd.f32 %v910_v50, %v312_v43 }
 0x1dd   : > { %935 = vst [vmem:[#allocation2 + $0x50] sm:$0xf] %v923_v48  ;;  %934 = vst [vmem:[#allocation2 + $0x48] sm:$0xf] %v922_v49 }
 0x1de   : > { %936 = vst [vmem:[#allocation2 + $0x58] sm:$0xf] %v924_v51 }
 0x1e3   : > { %v948_v52 = vld [vmem:[#allocation2 + $0x40] sm:$0xf] }
 0x1e4   : > { %v982_v53 = vadd.f32 %v957_v20, %v948_v52  ;;  %v950_v54 = vld [vmem:[#allocation2 + $0x50] sm:$0xf]  ;;  %v949_v55 = vld [vmem:[#allocation2 + $0x48] sm:$0xf] }
 0x1e5   : > { %v984_v56 = vadd.f32 %v965_v22, %v950_v54  ;;  %v983_v57 = vadd.f32 %v961_v23, %v949_v55  ;;  %v951_v58 = vld [vmem:[#allocation2 + $0x58] sm:$0xf] }
 0x1e6   : > { %994 = vst [vmem:[%s2191_s19 + $0x40] sm:$0xf] %v982_v53  ;;  %v985_v59 = vadd.f32 %v969_v26, %v951_v58 }
 0x1e7   : > { %996 = vst [vmem:[%s2191_s19 + $0x50] sm:$0xf] %v984_v56  ;;  %995 = vst [vmem:[%s2191_s19 + $0x48] sm:$0xf] %v983_v57 }
 0x1e8   : > { %997 = vst [vmem:[%s2191_s19 + $0x58] sm:$0xf] %v985_v59 }
 0x1e9   : > { %1619 = shalt.err (!%p1616_p2)
}
 0x1ea   : > { %s1620_s7 = scalar_lea.hbm %s2206_s5, 1536  ;;  %s1624_s28 = scalar_lea.hbm %s2263_s3, 4608 }
 0x1eb   : > { %p1621_p5 = scmp.ne.s32.totalorder %s2206_s5, %s1620_s7  ;;  %p1625_p4 = scmp.lt.u32.totalorder %s2206_s5, %s2263_s3 }
 0x1ec   : > { %p1626_p7 = scmp.lt.u32.totalorder %s1624_s28, %s1620_s7  ;;  %p1628_p9 = scmp.lt.u32.totalorder %s1620_s7, %s2206_s5 }
 0x1ed   : > { %p1622_p11 = pnand %p1621_p5, %p2287_p12 }
 0x1ee   : > { %p1627_p0 = por %p1626_p7, %p1625_p4 }
 0x1ef   : > { %p1623_p8 = pneg %p1622_p11 }
 0x1f0   : > { %p1629_p13 = por %p1628_p9, %p1627_p0 }
 0x1f2   : > { %p1630_p6 = pnand %p1629_p13, %p1623_p8 }
 0x1f4   : > { %1633 = shalt.err (!%p1630_p6)
}
 0x1f5   : > { %s1702_s10 = smov 512   ;;  %s1703_s19 = smov 1536  }
 0x1f6   : > { %s1704_s11 = smov 32  }
 0x1f7   : > { %1441 = dma.vmem_to_hbm [thread:$0]  (%p2287_p12), %s2208_s22, 1536, %s2206_s5, %s999_s15, %s1702_s10, %s1703_s19, %s1704_s11  }
 0x1f8 PF: > { %p1461_p3 = scmp.ge.s32.totalorder %s1692_s17, 2  ;;  %s1030_s9 = sand.u32 1, %s1672_s12  }
 0x1f9   : > { %p2288_p1 = scmp.ne.s32.totalorder %s2277_s4, 0  ;;  %s1031_s23 = scalar_lea.sflag [#allocation5], %s1030_s9 }
 0x1fb   : > { %p1455_p10 = pnand %p1461_p3, %p2288_p1 }
 0x1fd   : > { %1667 = dma.done.wait (!%p1455_p10), %s1031_s23, 1536  }
 0x1fe   : > { %1669 = vsyncadd (!%p1455_p10), %s1031_s23, 4294965760  ;;  %s20_s17 = sadd.s32 1, %s1692_s17   ;;  %s2289_s12 = smov %s1676_s13 }
 0x1ff   : > { %p17_p2 = scmp.ge.s32.totalorder %s20_s17, 5   ;;  %s2290_s13 = smov %s1680_s14 }
 0x200   : > { %s2291_s14 = smov %s1775_s24  ;;  %s2292_s15 = smov %s1688_s16 }
 0x201   : > { %s2293_s16 = smov %s2295_s18  ;;  %19 = sbr.rel (!%p17_p2) target bundleno = 9 (0x9), region = 102 }
 0x208   :  { %1036 = vsyncpa [#allocation4], 1 }
 0x209   :  { %1038 = vsyncpa [#allocation4 + $0x1], 1 }
 0x20a   :  { %1039 = vsyncpa [#allocation7], 1 }
 0x20b   :  { %1041 = vsyncpa [#allocation7 + $0x1], 1 }
 0x20c   :  { %1042 = vsyncpa [#allocation5], 1 }
 0x20d   :  { %1044 = vsyncpa [#allocation5 + $0x1], 1 }

</bundles_post_ra>
